<compile_context>
chip_gen: v6e
topology: v6e:2x2x1
jax: 0.10.0
libtpu: 0.0.40
codegen_flags: <defaults>
</compile_context>

<pallas_src>
import jax
import jax.numpy as jnp
from jax import lax
from jax.experimental import pallas as pl
from jax.experimental.pallas import tpu as pltpu


# ---------------------------------------------------------------------------
# Pallas kernels
# ---------------------------------------------------------------------------
def _sigmoid(x):
    # sigmoid via tanh identity: a single EUP push instead of exp + reciprocal.
    return 0.5 * jnp.tanh(0.5 * x) + 0.5


def gate_proj_kernel(x_ref, w_ref, b_ref, gf_ref, gb_ref):
    """g = x @ [Wih_f | Wih_b] + [b_f | b_b]; halves stored as bf16."""
    x = x_ref[...].astype(jnp.bfloat16)
    y = jnp.dot(x, w_ref[...], preferred_element_type=jnp.float32) + b_ref[...]
    four_h = gf_ref.shape[-1]
    gf_ref[...] = y[:, :four_h].astype(gf_ref.dtype)
    gb_ref[...] = y[:, four_h:].astype(gb_ref.dtype)


def _cell_step(g_in, h, c, whh):
    """One LSTM cell step. g_in (B,4H) bf16 precomputed gates, order [i,f,o,g]."""
    H = h.shape[-1]
    g = g_in.astype(jnp.float32) + jnp.dot(h, whh,
                                           preferred_element_type=jnp.float32)
    s = _sigmoid(g[:, :3 * H])          # contiguous sigmoid slab [i | f | o]
    gg = jnp.tanh(g[:, 3 * H:])
    i = s[:, 0:H]
    f = s[:, H:2 * H]
    o = s[:, 2 * H:3 * H]
    c_new = f * c + i * gg
    h_new = o * jnp.tanh(c_new)
    return h_new.astype(jnp.bfloat16), c_new


def bilstm_kernel(gf_ref, gb_ref, whh_f_ref, whh_b_ref,
                  rec_f_ref, rec_b_ref,
                  h_f_ref, c_f_ref, h_b_ref, c_b_ref):
    chunk = pl.program_id(0)

    @pl.when(chunk == 0)
    def _():
        h_f_ref[...] = jnp.zeros_like(h_f_ref)
        c_f_ref[...] = jnp.zeros_like(c_f_ref)
        h_b_ref[...] = jnp.zeros_like(h_b_ref)
        c_b_ref[...] = jnp.zeros_like(c_b_ref)

    whh_f = whh_f_ref[...]
    whh_b = whh_b_ref[...]
    Tc = rec_f_ref.shape[0]

    def step(j, carry):
        hf, cf, hb, cb = carry
        jb = Tc - 1 - j
        # forward direction: local timestep j of the forward chunk
        hf, cf = _cell_step(gf_ref[j], hf, cf, whh_f)
        rec_f_ref[j] = hf
        # backward direction: local timestep Tc-1-j of the reversed chunk
        hb, cb = _cell_step(gb_ref[jb], hb, cb, whh_b)
        rec_b_ref[jb] = hb
        return hf, cf, hb, cb

    carry0 = (h_f_ref[...], c_f_ref[...], h_b_ref[...], c_b_ref[...])
    hf, cf, hb, cb = lax.fori_loop(0, Tc, step, carry0, unroll=True)

    # Spill the register-carried state to VMEM scratch once per chunk.
    h_f_ref[...] = hf
    c_f_ref[...] = cf
    h_b_ref[...] = hb
    c_b_ref[...] = cb
    # TODO(synk): on v7x, split the two independent direction chains across the
    # 2 TensorCores (leading "parallel" direction grid axis / pl.core_map) for
    # ~2x on this serial stage; kept interleaved here since v5e/v6e have 1 TC.


def embed_kernel(rf_ref, rb_ref, wt_ref, wb_ref, b_ref, o_ref):
    """y = rec_f @ w_top + rec_b @ w_bot + b  (== concat(rec_f,rec_b) @ W + b)."""
    o_ref[...] = (jnp.dot(rf_ref[...], wt_ref[...],
                          preferred_element_type=jnp.float32)
                  + jnp.dot(rb_ref[...], wb_ref[...],
                            preferred_element_type=jnp.float32)
                  + b_ref[...]).astype(o_ref.dtype)


# ---------------------------------------------------------------------------
# Tiling helpers
# ---------------------------------------------------------------------------
def _round_up(x, m):
    return (x + m - 1) // m * m


def _row_tile(rows, per_row_bytes, fixed_bytes, budget_bytes=12 << 20, cap=1024):
    """Largest multiple-of-8 row tile whose double-buffered set fits the budget."""
    avail = max(budget_bytes - 2 * fixed_bytes, 1 << 20)
    tile = avail // (2 * per_row_bytes)
    tile = max(8, min(cap, (tile // 8) * 8))
    tile = min(tile, _round_up(rows, 8))
    return int(tile)


def _time_chunk(T, cap=16):
    # TODO(synk): prime T degrades to Tc=1 (per-timestep grid); padding/masking
    # the time axis would keep the chunked pipeline for awkward T.
    tc = 1
    for cand in range(1, min(T, cap) + 1):
        if T % cand == 0:
            tc = cand
    return tc


# ---------------------------------------------------------------------------
# Parameter preparation (host-side, one time): gate reorder + bf16 + padding
# ---------------------------------------------------------------------------
def prepare_params(params):
    """Reorder gate columns [i,f,g,o]->[i,f,o,g], fuse/cast to bf16, pad out Linear."""
    def perm(w):                       # acts on the trailing 4H axis
        H4 = w.shape[-1]
        H = H4 // 4
        return jnp.concatenate(
            [w[..., :2 * H], w[..., 3 * H:], w[..., 2 * H:3 * H]], axis=-1)

    out_dim = params["w_top"].shape[-1]
    out_pad = _round_up(out_dim, 128)
    pad = ((0, 0), (0, out_pad - out_dim))
    return {
        "wih":   jnp.concatenate([perm(params["wih_f"]), perm(params["wih_b"])],
                                 axis=1).astype(jnp.bfloat16),        # (inp, 8H)
        "b_ih":  jnp.concatenate([perm(params["b_f"]), perm(params["b_b"])],
                                 axis=1).astype(jnp.float32),         # (1, 8H)
        "whh_f": perm(params["whh_f"]).astype(jnp.bfloat16),          # (H, 4H)
        "whh_b": perm(params["whh_b"]).astype(jnp.bfloat16),
        "w_top": jnp.pad(params["w_top"], pad).astype(jnp.bfloat16),  # (H, out_pad)
        "w_bot": jnp.pad(params["w_bot"], pad).astype(jnp.bfloat16),
        "b_emb": jnp.pad(params["b_emb"], pad).astype(jnp.float32),   # (1, out_pad)
    }


# ---------------------------------------------------------------------------
# Forward wrapper
# ---------------------------------------------------------------------------
def bidirectional_forward(X, prep, *, out_dim):
    T, B, inp = X.shape
    H = prep["whh_f"].shape[0]
    four_h = 4 * H
    eight_h = 8 * H
    out_pad = prep["w_top"].shape[-1]
    rows = T * B

    # ----- Stage 1: fused input projections for all timesteps / both dirs -----
    X2d = X.reshape(rows, inp)
    tm1 = _row_tile(rows,
                    per_row_bytes=inp * 4 + 2 * four_h * 2,
                    fixed_bytes=inp * eight_h * 2 + eight_h * 4)
    rows1 = _round_up(rows, tm1)
    if rows1 != rows:
        X2d = jnp.pad(X2d, ((0, rows1 - rows), (0, 0)))

    gf2d, gb2d = pl.pallas_call(
        gate_proj_kernel,
        out_shape=(jax.ShapeDtypeStruct((rows1, four_h), jnp.bfloat16),
                   jax.ShapeDtypeStruct((rows1, four_h), jnp.bfloat16)),
        grid_spec=pltpu.PrefetchScalarGridSpec(
            num_scalar_prefetch=0,
            grid=(rows1 // tm1,),
            in_specs=[
                pl.BlockSpec((tm1, inp), lambda i: (i, 0)),
                pl.BlockSpec((inp, eight_h), lambda i: (0, 0)),
                pl.BlockSpec((1, eight_h), lambda i: (0, 0)),
            ],
            out_specs=[
                pl.BlockSpec((tm1, four_h), lambda i: (i, 0)),
                pl.BlockSpec((tm1, four_h), lambda i: (i, 0)),
            ],
        ),
        compiler_params=pltpu.CompilerParams(
            dimension_semantics=("parallel",),
            vmem_limit_bytes=32 * 1024 * 1024),
    )(X2d, prep["wih"], prep["b_ih"])

    gf = gf2d[:rows].reshape(T, B, four_h)
    gb = gb2d[:rows].reshape(T, B, four_h)

    # ----- Stage 2: chunked bidirectional recurrence (bf16 matmuls, f32 cell) -----
    Tc = _time_chunk(T)
    nC = T // Tc
    rec_f, rec_b = pl.pallas_call(
        bilstm_kernel,
        out_shape=(jax.ShapeDtypeStruct((T, B, H), jnp.bfloat16),
                   jax.ShapeDtypeStruct((T, B, H), jnp.bfloat16)),
        grid_spec=pltpu.PrefetchScalarGridSpec(
            num_scalar_prefetch=0,
            grid=(nC,),
            in_specs=[
                pl.BlockSpec((Tc, B, four_h), lambda c: (c, 0, 0)),           # fwd gates
                pl.BlockSpec((Tc, B, four_h), lambda c: (nC - 1 - c, 0, 0)),  # bwd gates
                pl.BlockSpec((H, four_h), lambda c: (0, 0)),                  # W_hh fwd
                pl.BlockSpec((H, four_h), lambda c: (0, 0)),                  # W_hh bwd
            ],
            out_specs=[
                pl.BlockSpec((Tc, B, H), lambda c: (c, 0, 0)),
                pl.BlockSpec((Tc, B, H), lambda c: (nC - 1 - c, 0, 0)),
            ],
            scratch_shapes=[
                pltpu.VMEM((B, H), jnp.bfloat16),   # h_f (bf16 matmul operand)
                pltpu.VMEM((B, H), jnp.float32),    # c_f (kept f32)
                pltpu.VMEM((B, H), jnp.bfloat16),   # h_b
                pltpu.VMEM((B, H), jnp.float32),    # c_b
            ],
        ),
        compiler_params=pltpu.CompilerParams(
            dimension_semantics=("arbitrary",),
            vmem_limit_bytes=32 * 1024 * 1024),
    )(gf, gb, prep["whh_f"], prep["whh_b"])

    # ----- Stage 3: output Linear, split halves, lane-dense padded out dim -----
    rf2d = rec_f.reshape(rows, H)
    rb2d = rec_b.reshape(rows, H)
    tm2 = _row_tile(rows,
                    per_row_bytes=2 * H * 2 + out_pad * 4,
                    fixed_bytes=2 * H * out_pad * 2 + out_pad * 4)
    rows2 = _round_up(rows, tm2)
    if rows2 != rows:
        rpad = ((0, rows2 - rows), (0, 0))
        rf2d = jnp.pad(rf2d, rpad)
        rb2d = jnp.pad(rb2d, rpad)

    y2d = pl.pallas_call(
        embed_kernel,
        out_shape=jax.ShapeDtypeStruct((rows2, out_pad), jnp.float32),
        grid_spec=pltpu.PrefetchScalarGridSpec(
            num_scalar_prefetch=0,
            grid=(rows2 // tm2,),
            in_specs=[
                pl.BlockSpec((tm2, H), lambda i: (i, 0)),
                pl.BlockSpec((tm2, H), lambda i: (i, 0)),
                pl.BlockSpec((H, out_pad), lambda i: (0, 0)),
                pl.BlockSpec((H, out_pad), lambda i: (0, 0)),
                pl.BlockSpec((1, out_pad), lambda i: (0, 0)),
            ],
            out_specs=pl.BlockSpec((tm2, out_pad), lambda i: (i, 0)),
        ),
        compiler_params=pltpu.CompilerParams(
            dimension_semantics=("parallel",),
            vmem_limit_bytes=32 * 1024 * 1024),
    )(rf2d, rb2d, prep["w_top"], prep["w_bot"], prep["b_emb"])

    return y2d[:rows, :out_dim].reshape(T, B, out_dim)


# ---------------------------------------------------------------------------
# Pure-JAX f32 reference (PyTorch gate order [i,f,g,o]) for validation
# ---------------------------------------------------------------------------
def _lstm_direction_ref(X, wih, whh, b):
    T, B, _ = X.shape
    H = whh.shape[0]
    h = jnp.zeros((B, H), jnp.float32)
    c = jnp.zeros((B, H), jnp.float32)
    outs = []
    for t in range(T):
        g = X[t] @ wih + h @ whh + b
        i = jax.nn.sigmoid(g[:, 0:H])
        f = jax.nn.sigmoid(g[:, H:2 * H])
        gg = jnp.tanh(g[:, 2 * H:3 * H])
        o = jax.nn.sigmoid(g[:, 3 * H:4 * H])
        c = f * c + i * gg
        h = o * jnp.tanh(c)
        outs.append(h)
    return jnp.stack(outs, 0)


def bidirectional_ref(X, params):
    rec_f = _lstm_direction_ref(X, params["wih_f"], params["whh_f"], params["b_f"])
    rec_b = _lstm_direction_ref(X[::-1], params["wih_b"], params["whh_b"],
                                params["b_b"])[::-1]
    return rec_f @ params["w_top"] + rec_b @ params["w_bot"] + params["b_emb"]


# ---------------------------------------------------------------------------
# Deterministic parameter init (PyTorch shapes; gates stacked [i,f,g,o] on 4H)
# ---------------------------------------------------------------------------
def init_params(key, inp, hidden, out_dim):
    ks = jax.random.split(key, 10)
    k_lstm = hidden ** -0.5
    k_lin = (2 * hidden) ** -0.5
    u = lambda kk, shape, lim: jax.random.uniform(kk, shape, jnp.float32, -lim, lim)
    H4 = 4 * hidden
    w_emb_t = u(ks[8], (2 * hidden, out_dim), k_lin)   # Linear(2H, out) weight^T
    return {
        # weight_ih (4H, inp) / weight_hh (4H, H) stored transposed, gates fused on 4H
        "wih_f": u(ks[0], (inp, H4), k_lstm),
        "whh_f": u(ks[1], (hidden, H4), k_lstm),
        "b_f":   u(ks[2], (1, H4), k_lstm) + u(ks[3], (1, H4), k_lstm),  # b_ih + b_hh
        "wih_b": u(ks[4], (inp, H4), k_lstm),
        "whh_b": u(ks[5], (hidden, H4), k_lstm),
        "b_b":   u(ks[6], (1, H4), k_lstm) + u(ks[7], (1, H4), k_lstm),
        # output Linear split: rows 0:H act on forward states, H:2H on backward
        "w_top": w_emb_t[:hidden],
        "w_bot": w_emb_t[hidden:],
        "b_emb": u(ks[9], (1, out_dim), k_lin),
    }


if __name__ == "__main__":
    T, B, inp, hidden, out_dim = 8, 2, 16, 32, 16
    key = jax.random.PRNGKey(0)
    kx, kp = jax.random.split(key)
    X = jax.random.normal(kx, (T, B, inp), jnp.float32)
    params = init_params(kp, inp, hidden, out_dim)
    prep = prepare_params(params)           # one-time host-side weight prep

    fwd = jax.jit(bidirectional_forward, static_argnames=("out_dim",))
    y = fwd(X, prep, out_dim=out_dim)
    y = jax.block_until_ready(y)

    y_ref = bidirectional_ref(X, params)    # f32 reference
    assert y.shape == (T, B, out_dim), y.shape
    max_err = float(jnp.max(jnp.abs(y - y_ref)))
    # Tolerance loosened vs f32-only version: kernel uses bf16 matmul operands
    # and bf16 HBM intermediates (f32 accumulation / f32 cell state).
    assert jnp.allclose(y, y_ref, atol=3e-2, rtol=3e-2), max_err
    print("KERNEL_OK")
</pallas_src>

<mosaic_0001>
module attributes {stable_mosaic.version = 11 : i64} {
  func.func @gate_proj_kernel(%arg0: i32, %arg1: memref<16x16xf32, #tpu.memory_space<vmem>>, %arg2: memref<16x256xbf16, #tpu.memory_space<vmem>>, %arg3: memref<1x256xf32, #tpu.memory_space<vmem>>, %arg4: memref<16x128xbf16, #tpu.memory_space<vmem>>, %arg5: memref<16x128xbf16, #tpu.memory_space<vmem>>) attributes {dimension_semantics = [#tpu.dimension_semantics<parallel>], iteration_bounds = array<i64: 1>, scalar_prefetch = 0 : i64, scratch_operands = 0 : i64, tpu.core_type = #tpu.core_type<tc>, window_params = [{transform_indices = @transform_0, window_bounds = array<i64: 16, 16>}, {pipeline_mode = #tpu.pipeline_mode<synchronous>, transform_indices = @transform_1, window_bounds = array<i64: 16, 256>}, {pipeline_mode = #tpu.pipeline_mode<synchronous>, transform_indices = @transform_2, window_bounds = array<i64: 1, 256>}, {transform_indices = @transform_3, window_bounds = array<i64: 16, 128>}, {transform_indices = @transform_4, window_bounds = array<i64: 16, 128>}]} {
    %c0 = arith.constant 0 : index
    %c0_0 = arith.constant 0 : index
    %0 = vector.load %arg1[%c0, %c0_0] : memref<16x16xf32, #tpu.memory_space<vmem>>, vector<16x16xf32>
    %1 = arith.truncf %0 : vector<16x16xf32> to vector<16x16xbf16>
    %c0_1 = arith.constant 0 : index
    %c0_2 = arith.constant 0 : index
    %2 = vector.load %arg2[%c0_1, %c0_2] : memref<16x256xbf16, #tpu.memory_space<vmem>>, vector<16x256xbf16>
    %cst = arith.constant dense<0.000000e+00> : vector<16x256xf32>
    %3 = tpu.matmul %1, %2, %cst {dimension_numbers = #tpu.dot_dimension_numbers<[1], [0], [0], [1], [0, 0, 1, 1], [], []>} : vector<16x16xbf16>, vector<16x256xbf16>, vector<16x256xf32> -> vector<16x256xf32>
    %c0_3 = arith.constant 0 : index
    %c0_4 = arith.constant 0 : index
    %4 = vector.load %arg3[%c0_3, %c0_4] : memref<1x256xf32, #tpu.memory_space<vmem>>, vector<1x256xf32>
    %5 = vector.broadcast %4 : vector<1x256xf32> to vector<16x256xf32>
    %6 = arith.addf %3, %5 : vector<16x256xf32>
    %7 = vector.extract_strided_slice %6 {offsets = [0, 0], sizes = [16, 128], strides = [1, 1]} : vector<16x256xf32> to vector<16x128xf32>
    %8 = arith.truncf %7 : vector<16x128xf32> to vector<16x128xbf16>
    %c0_5 = arith.constant 0 : index
    %c0_6 = arith.constant 0 : index
    %9 = vector.load %arg4[%c0_5, %c0_6] : memref<16x128xbf16, #tpu.memory_space<vmem>>, vector<16x128xbf16>
    tpu.vector_store %arg4[%c0_5, %c0_6], %8 {strides = array<i32>} : memref<16x128xbf16, #tpu.memory_space<vmem>>, vector<16x128xbf16>,
    %10 = vector.extract_strided_slice %6 {offsets = [0, 128], sizes = [16, 128], strides = [1, 1]} : vector<16x256xf32> to vector<16x128xf32>
    %11 = arith.truncf %10 : vector<16x128xf32> to vector<16x128xbf16>
    %c0_7 = arith.constant 0 : index
    %c0_8 = arith.constant 0 : index
    %12 = vector.load %arg5[%c0_7, %c0_8] : memref<16x128xbf16, #tpu.memory_space<vmem>>, vector<16x128xbf16>
    tpu.vector_store %arg5[%c0_7, %c0_8], %11 {strides = array<i32>} : memref<16x128xbf16, #tpu.memory_space<vmem>>, vector<16x128xbf16>,
    return
  }
  func.func @transform_0(%arg0: i32) -> (i32, i32) {
    %c0_i32 = arith.constant 0 : i32
    %c0_i32_0 = arith.constant 0 : i32
    return %arg0, %c0_i32 : i32, i32
  }
  func.func @transform_1(%arg0: i32) -> (i32, i32) {
    %c0_i32 = arith.constant 0 : i32
    %c0_i32_0 = arith.constant 0 : i32
    %c0_i32_1 = arith.constant 0 : i32
    return %c0_i32, %c0_i32_0 : i32, i32
  }
  func.func @transform_2(%arg0: i32) -> (i32, i32) {
    %c0_i32 = arith.constant 0 : i32
    %c0_i32_0 = arith.constant 0 : i32
    %c0_i32_1 = arith.constant 0 : i32
    return %c0_i32, %c0_i32_0 : i32, i32
  }
  func.func @transform_3(%arg0: i32) -> (i32, i32) {
    %c0_i32 = arith.constant 0 : i32
    %c0_i32_0 = arith.constant 0 : i32
    return %arg0, %c0_i32 : i32, i32
  }
  func.func @transform_4(%arg0: i32) -> (i32, i32) {
    %c0_i32 = arith.constant 0 : i32
    %c0_i32_0 = arith.constant 0 : i32
    return %arg0, %c0_i32 : i32, i32
  }
}

module attributes {stable_mosaic.version = 11 : i64} {
  func.func @embed_kernel(%arg0: i32, %arg1: memref<16x32xbf16, #tpu.memory_space<vmem>>, %arg2: memref<16x32xbf16, #tpu.memory_space<vmem>>, %arg3: memref<32x128xbf16, #tpu.memory_space<vmem>>, %arg4: memref<32x128xbf16, #tpu.memory_space<vmem>>, %arg5: memref<1x128xf32, #tpu.memory_space<vmem>>, %arg6: memref<16x128xf32, #tpu.memory_space<vmem>>) attributes {dimension_semantics = [#tpu.dimension_semantics<parallel>], iteration_bounds = array<i64: 1>, scalar_prefetch = 0 : i64, scratch_operands = 0 : i64, tpu.core_type = #tpu.core_type<tc>, window_params = [{transform_indices = @transform_0, window_bounds = array<i64: 16, 32>}, {transform_indices = @transform_1, window_bounds = array<i64: 16, 32>}, {pipeline_mode = #tpu.pipeline_mode<synchronous>, transform_indices = @transform_2, window_bounds = array<i64: 32, 128>}, {pipeline_mode = #tpu.pipeline_mode<synchronous>, transform_indices = @transform_3, window_bounds = array<i64: 32, 128>}, {pipeline_mode = #tpu.pipeline_mode<synchronous>, transform_indices = @transform_4, window_bounds = array<i64: 1, 128>}, {transform_indices = @transform_5, window_bounds = array<i64: 16, 128>}]} {
    %c0 = arith.constant 0 : index
    %c0_0 = arith.constant 0 : index
    %0 = vector.load %arg1[%c0, %c0_0] : memref<16x32xbf16, #tpu.memory_space<vmem>>, vector<16x32xbf16>
    %c0_1 = arith.constant 0 : index
    %c0_2 = arith.constant 0 : index
    %1 = vector.load %arg3[%c0_1, %c0_2] : memref<32x128xbf16, #tpu.memory_space<vmem>>, vector<32x128xbf16>
    %cst = arith.constant dense<0.000000e+00> : vector<16x128xf32>
    %2 = tpu.matmul %0, %1, %cst {dimension_numbers = #tpu.dot_dimension_numbers<[1], [0], [0], [1], [0, 0, 1, 1], [], []>} : vector<16x32xbf16>, vector<32x128xbf16>, vector<16x128xf32> -> vector<16x128xf32>
    %c0_3 = arith.constant 0 : index
    %c0_4 = arith.constant 0 : index
    %3 = vector.load %arg2[%c0_3, %c0_4] : memref<16x32xbf16, #tpu.memory_space<vmem>>, vector<16x32xbf16>
    %c0_5 = arith.constant 0 : index
    %c0_6 = arith.constant 0 : index
    %4 = vector.load %arg4[%c0_5, %c0_6] : memref<32x128xbf16, #tpu.memory_space<vmem>>, vector<32x128xbf16>
    %cst_7 = arith.constant dense<0.000000e+00> : vector<16x128xf32>
    %5 = tpu.matmul %3, %4, %cst_7 {dimension_numbers = #tpu.dot_dimension_numbers<[1], [0], [0], [1], [0, 0, 1, 1], [], []>} : vector<16x32xbf16>, vector<32x128xbf16>, vector<16x128xf32> -> vector<16x128xf32>
    %6 = arith.addf %2, %5 : vector<16x128xf32>
    %c0_8 = arith.constant 0 : index
    %c0_9 = arith.constant 0 : index
    %7 = vector.load %arg5[%c0_8, %c0_9] : memref<1x128xf32, #tpu.memory_space<vmem>>, vector<1x128xf32>
    %8 = vector.broadcast %7 : vector<1x128xf32> to vector<16x128xf32>
    %9 = arith.addf %6, %8 : vector<16x128xf32>
    %c0_10 = arith.constant 0 : index
    %c0_11 = arith.constant 0 : index
    %10 = vector.load %arg6[%c0_10, %c0_11] : memref<16x128xf32, #tpu.memory_space<vmem>>, vector<16x128xf32>
    tpu.vector_store %arg6[%c0_10, %c0_11], %9 {strides = array<i32>} : memref<16x128xf32, #tpu.memory_space<vmem>>, vector<16x128xf32>,
    return
  }
  func.func @transform_0(%arg0: i32) -> (i32, i32) {
    %c0_i32 = arith.constant 0 : i32
    %c0_i32_0 = arith.constant 0 : i32
    return %arg0, %c0_i32 : i32, i32
  }
  func.func @transform_1(%arg0: i32) -> (i32, i32) {
    %c0_i32 = arith.constant 0 : i32
    %c0_i32_0 = arith.constant 0 : i32
    return %arg0, %c0_i32 : i32, i32
  }
  func.func @transform_2(%arg0: i32) -> (i32, i32) {
    %c0_i32 = arith.constant 0 : i32
    %c0_i32_0 = arith.constant 0 : i32
    %c0_i32_1 = arith.constant 0 : i32
    return %c0_i32, %c0_i32_0 : i32, i32
  }
  func.func @transform_3(%arg0: i32) -> (i32, i32) {
    %c0_i32 = arith.constant 0 : i32
    %c0_i32_0 = arith.constant 0 : i32
    %c0_i32_1 = arith.constant 0 : i32
    return %c0_i32, %c0_i32_0 : i32, i32
  }
  func.func @transform_4(%arg0: i32) -> (i32, i32) {
    %c0_i32 = arith.constant 0 : i32
    %c0_i32_0 = arith.constant 0 : i32
    %c0_i32_1 = arith.constant 0 : i32
    return %c0_i32, %c0_i32_0 : i32, i32
  }
  func.func @transform_5(%arg0: i32) -> (i32, i32) {
    %c0_i32 = arith.constant 0 : i32
    %c0_i32_0 = arith.constant 0 : i32
    return %arg0, %c0_i32 : i32, i32
  }
}

module attributes {stable_mosaic.version = 11 : i64} {
  func.func @bilstm_kernel(%arg0: i32, %arg1: memref<8x2x128xbf16, #tpu.memory_space<vmem>>, %arg2: memref<8x2x128xbf16, #tpu.memory_space<vmem>>, %arg3: memref<32x128xbf16, #tpu.memory_space<vmem>>, %arg4: memref<32x128xbf16, #tpu.memory_space<vmem>>, %arg5: memref<8x2x32xbf16, #tpu.memory_space<vmem>>, %arg6: memref<8x2x32xbf16, #tpu.memory_space<vmem>>, %arg7: memref<2x32xbf16, #tpu.memory_space<vmem>>, %arg8: memref<2x32xf32, #tpu.memory_space<vmem>>, %arg9: memref<2x32xbf16, #tpu.memory_space<vmem>>, %arg10: memref<2x32xf32, #tpu.memory_space<vmem>>) attributes {dimension_semantics = [#tpu.dimension_semantics<arbitrary>], iteration_bounds = array<i64: 1>, scalar_prefetch = 0 : i64, scratch_operands = 4 : i64, tpu.core_type = #tpu.core_type<tc>, window_params = [{transform_indices = @transform_0, window_bounds = array<i64: 8, 2, 128>}, {transform_indices = @transform_1, window_bounds = array<i64: 8, 2, 128>}, {pipeline_mode = #tpu.pipeline_mode<synchronous>, transform_indices = @transform_2, window_bounds = array<i64: 32, 128>}, {pipeline_mode = #tpu.pipeline_mode<synchronous>, transform_indices = @transform_3, window_bounds = array<i64: 32, 128>}, {transform_indices = @transform_4, window_bounds = array<i64: 8, 2, 32>}, {transform_indices = @transform_5, window_bounds = array<i64: 8, 2, 32>}]} {
    %c0_i32 = arith.constant 0 : i32
    %0 = arith.cmpi eq, %arg0, %c0_i32 : i32
    %1 = arith.extui %0 : i1 to i32
    %c0_i32_0 = arith.constant 0 : i32
    %2 = arith.cmpi ne, %1, %c0_i32_0 : i32
    scf.if %2 {
      %cst_156 = arith.constant 0.000000e+00 : bf16
      %485 = vector.broadcast %cst_156 : bf16 to vector<2x32xbf16>
      %c0_157 = arith.constant 0 : index
      %c0_158 = arith.constant 0 : index
      %486 = vector.load %arg7[%c0_157, %c0_158] : memref<2x32xbf16, #tpu.memory_space<vmem>>, vector<2x32xbf16>
      tpu.vector_store %arg7[%c0_157, %c0_158], %485 {strides = array<i32>} : memref<2x32xbf16, #tpu.memory_space<vmem>>, vector<2x32xbf16>,
      %cst_159 = arith.constant 0.000000e+00 : f32
      %487 = vector.broadcast %cst_159 : f32 to vector<2x32xf32>
      %c0_160 = arith.constant 0 : index
      %c0_161 = arith.constant 0 : index
      %488 = vector.load %arg8[%c0_160, %c0_161] : memref<2x32xf32, #tpu.memory_space<vmem>>, vector<2x32xf32>
      tpu.vector_store %arg8[%c0_160, %c0_161], %487 {strides = array<i32>} : memref<2x32xf32, #tpu.memory_space<vmem>>, vector<2x32xf32>,
      %cst_162 = arith.constant 0.000000e+00 : bf16
      %489 = vector.broadcast %cst_162 : bf16 to vector<2x32xbf16>
      %c0_163 = arith.constant 0 : index
      %c0_164 = arith.constant 0 : index
      %490 = vector.load %arg9[%c0_163, %c0_164] : memref<2x32xbf16, #tpu.memory_space<vmem>>, vector<2x32xbf16>
      tpu.vector_store %arg9[%c0_163, %c0_164], %489 {strides = array<i32>} : memref<2x32xbf16, #tpu.memory_space<vmem>>, vector<2x32xbf16>,
      %cst_165 = arith.constant 0.000000e+00 : f32
      %491 = vector.broadcast %cst_165 : f32 to vector<2x32xf32>
      %c0_166 = arith.constant 0 : index
      %c0_167 = arith.constant 0 : index
      %492 = vector.load %arg10[%c0_166, %c0_167] : memref<2x32xf32, #tpu.memory_space<vmem>>, vector<2x32xf32>
      tpu.vector_store %arg10[%c0_166, %c0_167], %491 {strides = array<i32>} : memref<2x32xf32, #tpu.memory_space<vmem>>, vector<2x32xf32>,
    } else {
    }
    %c0 = arith.constant 0 : index
    %c0_1 = arith.constant 0 : index
    %3 = vector.load %arg3[%c0, %c0_1] : memref<32x128xbf16, #tpu.memory_space<vmem>>, vector<32x128xbf16>
    %c0_2 = arith.constant 0 : index
    %c0_3 = arith.constant 0 : index
    %4 = vector.load %arg4[%c0_2, %c0_3] : memref<32x128xbf16, #tpu.memory_space<vmem>>, vector<32x128xbf16>
    %c0_4 = arith.constant 0 : index
    %c0_5 = arith.constant 0 : index
    %5 = vector.load %arg7[%c0_4, %c0_5] : memref<2x32xbf16, #tpu.memory_space<vmem>>, vector<2x32xbf16>
    %c0_6 = arith.constant 0 : index
    %c0_7 = arith.constant 0 : index
    %6 = vector.load %arg8[%c0_6, %c0_7] : memref<2x32xf32, #tpu.memory_space<vmem>>, vector<2x32xf32>
    %c0_8 = arith.constant 0 : index
    %c0_9 = arith.constant 0 : index
    %7 = vector.load %arg9[%c0_8, %c0_9] : memref<2x32xbf16, #tpu.memory_space<vmem>>, vector<2x32xbf16>
    %c0_10 = arith.constant 0 : index
    %c0_11 = arith.constant 0 : index
    %8 = vector.load %arg10[%c0_10, %c0_11] : memref<2x32xf32, #tpu.memory_space<vmem>>, vector<2x32xf32>
    %c0_i32_12 = arith.constant 0 : i32
    %c7_i32 = arith.constant 7 : i32
    %9 = arith.subi %c7_i32, %c0_i32_12 : i32
    %10 = arith.index_cast %c0_i32_12 : i32 to index
    %c0_13 = arith.constant 0 : index
    %c0_14 = arith.constant 0 : index
    %11 = vector.load %arg1[%10, %c0_13, %c0_14] : memref<8x2x128xbf16, #tpu.memory_space<vmem>>, vector<1x2x128xbf16>
    %12 = vector.shape_cast %11 : vector<1x2x128xbf16> to vector<2x128xbf16>
    %13 = arith.extf %12 : vector<2x128xbf16> to vector<2x128xf32>
    %cst = arith.constant dense<0.000000e+00> : vector<2x128xf32>
    %14 = tpu.matmul %5, %3, %cst {dimension_numbers = #tpu.dot_dimension_numbers<[1], [0], [0], [1], [0, 0, 1, 1], [], []>} : vector<2x32xbf16>, vector<32x128xbf16>, vector<2x128xf32> -> vector<2x128xf32>
    %15 = arith.addf %13, %14 : vector<2x128xf32>
    %16 = vector.extract_strided_slice %15 {offsets = [0, 0], sizes = [2, 96], strides = [1, 1]} : vector<2x128xf32> to vector<2x96xf32>
    %cst_15 = arith.constant 5.000000e-01 : f32
    %17 = vector.broadcast %cst_15 : f32 to vector<2x96xf32>
    %18 = arith.mulf %17, %16 : vector<2x96xf32>
    %19 = math.tanh %18 : vector<2x96xf32>
    %cst_16 = arith.constant 5.000000e-01 : f32
    %20 = vector.broadcast %cst_16 : f32 to vector<2x96xf32>
    %21 = arith.mulf %20, %19 : vector<2x96xf32>
    %cst_17 = arith.constant 5.000000e-01 : f32
    %22 = vector.broadcast %cst_17 : f32 to vector<2x96xf32>
    %23 = arith.addf %21, %22 : vector<2x96xf32>
    %24 = vector.extract_strided_slice %15 {offsets = [0, 96], sizes = [2, 32], strides = [1, 1]} : vector<2x128xf32> to vector<2x32xf32>
    %25 = math.tanh %24 : vector<2x32xf32>
    %26 = vector.extract_strided_slice %23 {offsets = [0, 0], sizes = [2, 32], strides = [1, 1]} : vector<2x96xf32> to vector<2x32xf32>
    %27 = vector.extract_strided_slice %23 {offsets = [0, 32], sizes = [2, 32], strides = [1, 1]} : vector<2x96xf32> to vector<2x32xf32>
    %28 = vector.extract_strided_slice %23 {offsets = [0, 64], sizes = [2, 32], strides = [1, 1]} : vector<2x96xf32> to vector<2x32xf32>
    %29 = arith.mulf %27, %6 : vector<2x32xf32>
    %30 = arith.mulf %26, %25 : vector<2x32xf32>
    %31 = arith.addf %29, %30 : vector<2x32xf32>
    %32 = math.tanh %31 : vector<2x32xf32>
    %33 = arith.mulf %28, %32 : vector<2x32xf32>
    %34 = arith.truncf %33 : vector<2x32xf32> to vector<2x32xbf16>
    %35 = arith.index_cast %c0_i32_12 : i32 to index
    %c0_18 = arith.constant 0 : index
    %c0_19 = arith.constant 0 : index
    %36 = vector.load %arg5[%35, %c0_18, %c0_19] : memref<8x2x32xbf16, #tpu.memory_space<vmem>>, vector<1x2x32xbf16>
    %37 = vector.shape_cast %36 : vector<1x2x32xbf16> to vector<2x32xbf16>
    %38 = vector.shape_cast %34 : vector<2x32xbf16> to vector<1x2x32xbf16>
    tpu.vector_store %arg5[%35, %c0_18, %c0_19], %38 {strides = array<i32>} : memref<8x2x32xbf16, #tpu.memory_space<vmem>>, vector<1x2x32xbf16>,
    %39 = arith.index_cast %9 : i32 to index
    %c0_20 = arith.constant 0 : index
    %c0_21 = arith.constant 0 : index
    %40 = vector.load %arg2[%39, %c0_20, %c0_21] : memref<8x2x128xbf16, #tpu.memory_space<vmem>>, vector<1x2x128xbf16>
    %41 = vector.shape_cast %40 : vector<1x2x128xbf16> to vector<2x128xbf16>
    %42 = arith.extf %41 : vector<2x128xbf16> to vector<2x128xf32>
    %cst_22 = arith.constant dense<0.000000e+00> : vector<2x128xf32>
    %43 = tpu.matmul %7, %4, %cst_22 {dimension_numbers = #tpu.dot_dimension_numbers<[1], [0], [0], [1], [0, 0, 1, 1], [], []>} : vector<2x32xbf16>, vector<32x128xbf16>, vector<2x128xf32> -> vector<2x128xf32>
    %44 = arith.addf %42, %43 : vector<2x128xf32>
    %45 = vector.extract_strided_slice %44 {offsets = [0, 0], sizes = [2, 96], strides = [1, 1]} : vector<2x128xf32> to vector<2x96xf32>
    %cst_23 = arith.constant 5.000000e-01 : f32
    %46 = vector.broadcast %cst_23 : f32 to vector<2x96xf32>
    %47 = arith.mulf %46, %45 : vector<2x96xf32>
    %48 = math.tanh %47 : vector<2x96xf32>
    %cst_24 = arith.constant 5.000000e-01 : f32
    %49 = vector.broadcast %cst_24 : f32 to vector<2x96xf32>
    %50 = arith.mulf %49, %48 : vector<2x96xf32>
    %cst_25 = arith.constant 5.000000e-01 : f32
    %51 = vector.broadcast %cst_25 : f32 to vector<2x96xf32>
    %52 = arith.addf %50, %51 : vector<2x96xf32>
    %53 = vector.extract_strided_slice %44 {offsets = [0, 96], sizes = [2, 32], strides = [1, 1]} : vector<2x128xf32> to vector<2x32xf32>
    %54 = math.tanh %53 : vector<2x32xf32>
    %55 = vector.extract_strided_slice %52 {offsets = [0, 0], sizes = [2, 32], strides = [1, 1]} : vector<2x96xf32> to vector<2x32xf32>
    %56 = vector.extract_strided_slice %52 {offsets = [0, 32], sizes = [2, 32], strides = [1, 1]} : vector<2x96xf32> to vector<2x32xf32>
    %57 = vector.extract_strided_slice %52 {offsets = [0, 64], sizes = [2, 32], strides = [1, 1]} : vector<2x96xf32> to vector<2x32xf32>
    %58 = arith.mulf %56, %8 : vector<2x32xf32>
    %59 = arith.mulf %55, %54 : vector<2x32xf32>
    %60 = arith.addf %58, %59 : vector<2x32xf32>
    %61 = math.tanh %60 : vector<2x32xf32>
    %62 = arith.mulf %57, %61 : vector<2x32xf32>
    %63 = arith.truncf %62 : vector<2x32xf32> to vector<2x32xbf16>
    %64 = arith.index_cast %9 : i32 to index
    %c0_26 = arith.constant 0 : index
    %c0_27 = arith.constant 0 : index
    %65 = vector.load %arg6[%64, %c0_26, %c0_27] : memref<8x2x32xbf16, #tpu.memory_space<vmem>>, vector<1x2x32xbf16>
    %66 = vector.shape_cast %65 : vector<1x2x32xbf16> to vector<2x32xbf16>
    %67 = vector.shape_cast %63 : vector<2x32xbf16> to vector<1x2x32xbf16>
    tpu.vector_store %arg6[%64, %c0_26, %c0_27], %67 {strides = array<i32>} : memref<8x2x32xbf16, #tpu.memory_space<vmem>>, vector<1x2x32xbf16>,
    %c1_i32 = arith.constant 1 : i32
    %c7_i32_28 = arith.constant 7 : i32
    %68 = arith.subi %c7_i32_28, %c1_i32 : i32
    %69 = arith.index_cast %c1_i32 : i32 to index
    %c0_29 = arith.constant 0 : index
    %c0_30 = arith.constant 0 : index
    %70 = vector.load %arg1[%69, %c0_29, %c0_30] : memref<8x2x128xbf16, #tpu.memory_space<vmem>>, vector<1x2x128xbf16>
    %71 = vector.shape_cast %70 : vector<1x2x128xbf16> to vector<2x128xbf16>
    %72 = arith.extf %71 : vector<2x128xbf16> to vector<2x128xf32>
    %cst_31 = arith.constant dense<0.000000e+00> : vector<2x128xf32>
    %73 = tpu.matmul %34, %3, %cst_31 {dimension_numbers = #tpu.dot_dimension_numbers<[1], [0], [0], [1], [0, 0, 1, 1], [], []>} : vector<2x32xbf16>, vector<32x128xbf16>, vector<2x128xf32> -> vector<2x128xf32>
    %74 = arith.addf %72, %73 : vector<2x128xf32>
    %75 = vector.extract_strided_slice %74 {offsets = [0, 0], sizes = [2, 96], strides = [1, 1]} : vector<2x128xf32> to vector<2x96xf32>
    %cst_32 = arith.constant 5.000000e-01 : f32
    %76 = vector.broadcast %cst_32 : f32 to vector<2x96xf32>
    %77 = arith.mulf %76, %75 : vector<2x96xf32>
    %78 = math.tanh %77 : vector<2x96xf32>
    %cst_33 = arith.constant 5.000000e-01 : f32
    %79 = vector.broadcast %cst_33 : f32 to vector<2x96xf32>
    %80 = arith.mulf %79, %78 : vector<2x96xf32>
    %cst_34 = arith.constant 5.000000e-01 : f32
    %81 = vector.broadcast %cst_34 : f32 to vector<2x96xf32>
    %82 = arith.addf %80, %81 : vector<2x96xf32>
    %83 = vector.extract_strided_slice %74 {offsets = [0, 96], sizes = [2, 32], strides = [1, 1]} : vector<2x128xf32> to vector<2x32xf32>
    %84 = math.tanh %83 : vector<2x32xf32>
    %85 = vector.extract_strided_slice %82 {offsets = [0, 0], sizes = [2, 32], strides = [1, 1]} : vector<2x96xf32> to vector<2x32xf32>
    %86 = vector.extract_strided_slice %82 {offsets = [0, 32], sizes = [2, 32], strides = [1, 1]} : vector<2x96xf32> to vector<2x32xf32>
    %87 = vector.extract_strided_slice %82 {offsets = [0, 64], sizes = [2, 32], strides = [1, 1]} : vector<2x96xf32> to vector<2x32xf32>
    %88 = arith.mulf %86, %31 : vector<2x32xf32>
    %89 = arith.mulf %85, %84 : vector<2x32xf32>
    %90 = arith.addf %88, %89 : vector<2x32xf32>
    %91 = math.tanh %90 : vector<2x32xf32>
    %92 = arith.mulf %87, %91 : vector<2x32xf32>
    %93 = arith.truncf %92 : vector<2x32xf32> to vector<2x32xbf16>
    %94 = arith.index_cast %c1_i32 : i32 to index
    %c0_35 = arith.constant 0 : index
    %c0_36 = arith.constant 0 : index
    %95 = vector.load %arg5[%94, %c0_35, %c0_36] : memref<8x2x32xbf16, #tpu.memory_space<vmem>>, vector<1x2x32xbf16>
    %96 = vector.shape_cast %95 : vector<1x2x32xbf16> to vector<2x32xbf16>
    %97 = vector.shape_cast %93 : vector<2x32xbf16> to vector<1x2x32xbf16>
    tpu.vector_store %arg5[%94, %c0_35, %c0_36], %97 {strides = array<i32>} : memref<8x2x32xbf16, #tpu.memory_space<vmem>>, vector<1x2x32xbf16>,
    %98 = arith.index_cast %68 : i32 to index
    %c0_37 = arith.constant 0 : index
    %c0_38 = arith.constant 0 : index
    %99 = vector.load %arg2[%98, %c0_37, %c0_38] : memref<8x2x128xbf16, #tpu.memory_space<vmem>>, vector<1x2x128xbf16>
    %100 = vector.shape_cast %99 : vector<1x2x128xbf16> to vector<2x128xbf16>
    %101 = arith.extf %100 : vector<2x128xbf16> to vector<2x128xf32>
    %cst_39 = arith.constant dense<0.000000e+00> : vector<2x128xf32>
    %102 = tpu.matmul %63, %4, %cst_39 {dimension_numbers = #tpu.dot_dimension_numbers<[1], [0], [0], [1], [0, 0, 1, 1], [], []>} : vector<2x32xbf16>, vector<32x128xbf16>, vector<2x128xf32> -> vector<2x128xf32>
    %103 = arith.addf %101, %102 : vector<2x128xf32>
    %104 = vector.extract_strided_slice %103 {offsets = [0, 0], sizes = [2, 96], strides = [1, 1]} : vector<2x128xf32> to vector<2x96xf32>
    %cst_40 = arith.constant 5.000000e-01 : f32
    %105 = vector.broadcast %cst_40 : f32 to vector<2x96xf32>
    %106 = arith.mulf %105, %104 : vector<2x96xf32>
    %107 = math.tanh %106 : vector<2x96xf32>
    %cst_41 = arith.constant 5.000000e-01 : f32
    %108 = vector.broadcast %cst_41 : f32 to vector<2x96xf32>
    %109 = arith.mulf %108, %107 : vector<2x96xf32>
    %cst_42 = arith.constant 5.000000e-01 : f32
    %110 = vector.broadcast %cst_42 : f32 to vector<2x96xf32>
    %111 = arith.addf %109, %110 : vector<2x96xf32>
    %112 = vector.extract_strided_slice %103 {offsets = [0, 96], sizes = [2, 32], strides = [1, 1]} : vector<2x128xf32> to vector<2x32xf32>
    %113 = math.tanh %112 : vector<2x32xf32>
    %114 = vector.extract_strided_slice %111 {offsets = [0, 0], sizes = [2, 32], strides = [1, 1]} : vector<2x96xf32> to vector<2x32xf32>
    %115 = vector.extract_strided_slice %111 {offsets = [0, 32], sizes = [2, 32], strides = [1, 1]} : vector<2x96xf32> to vector<2x32xf32>
    %116 = vector.extract_strided_slice %111 {offsets = [0, 64], sizes = [2, 32], strides = [1, 1]} : vector<2x96xf32> to vector<2x32xf32>
    %117 = arith.mulf %115, %60 : vector<2x32xf32>
    %118 = arith.mulf %114, %113 : vector<2x32xf32>
    %119 = arith.addf %117, %118 : vector<2x32xf32>
    %120 = math.tanh %119 : vector<2x32xf32>
    %121 = arith.mulf %116, %120 : vector<2x32xf32>
    %122 = arith.truncf %121 : vector<2x32xf32> to vector<2x32xbf16>
    %123 = arith.index_cast %68 : i32 to index
    %c0_43 = arith.constant 0 : index
    %c0_44 = arith.constant 0 : index
    %124 = vector.load %arg6[%123, %c0_43, %c0_44] : memref<8x2x32xbf16, #tpu.memory_space<vmem>>, vector<1x2x32xbf16>
    %125 = vector.shape_cast %124 : vector<1x2x32xbf16> to vector<2x32xbf16>
    %126 = vector.shape_cast %122 : vector<2x32xbf16> to vector<1x2x32xbf16>
    tpu.vector_store %arg6[%123, %c0_43, %c0_44], %126 {strides = array<i32>} : memref<8x2x32xbf16, #tpu.memory_space<vmem>>, vector<1x2x32xbf16>,
    %c2_i32 = arith.constant 2 : i32
    %c7_i32_45 = arith.constant 7 : i32
    %127 = arith.subi %c7_i32_45, %c2_i32 : i32
    %128 = arith.index_cast %c2_i32 : i32 to index
    %c0_46 = arith.constant 0 : index
    %c0_47 = arith.constant 0 : index
    %129 = vector.load %arg1[%128, %c0_46, %c0_47] : memref<8x2x128xbf16, #tpu.memory_space<vmem>>, vector<1x2x128xbf16>
    %130 = vector.shape_cast %129 : vector<1x2x128xbf16> to vector<2x128xbf16>
    %131 = arith.extf %130 : vector<2x128xbf16> to vector<2x128xf32>
    %cst_48 = arith.constant dense<0.000000e+00> : vector<2x128xf32>
    %132 = tpu.matmul %93, %3, %cst_48 {dimension_numbers = #tpu.dot_dimension_numbers<[1], [0], [0], [1], [0, 0, 1, 1], [], []>} : vector<2x32xbf16>, vector<32x128xbf16>, vector<2x128xf32> -> vector<2x128xf32>
    %133 = arith.addf %131, %132 : vector<2x128xf32>
    %134 = vector.extract_strided_slice %133 {offsets = [0, 0], sizes = [2, 96], strides = [1, 1]} : vector<2x128xf32> to vector<2x96xf32>
    %cst_49 = arith.constant 5.000000e-01 : f32
    %135 = vector.broadcast %cst_49 : f32 to vector<2x96xf32>
    %136 = arith.mulf %135, %134 : vector<2x96xf32>
    %137 = math.tanh %136 : vector<2x96xf32>
    %cst_50 = arith.constant 5.000000e-01 : f32
    %138 = vector.broadcast %cst_50 : f32 to vector<2x96xf32>
    %139 = arith.mulf %138, %137 : vector<2x96xf32>
    %cst_51 = arith.constant 5.000000e-01 : f32
    %140 = vector.broadcast %cst_51 : f32 to vector<2x96xf32>
    %141 = arith.addf %139, %140 : vector<2x96xf32>
    %142 = vector.extract_strided_slice %133 {offsets = [0, 96], sizes = [2, 32], strides = [1, 1]} : vector<2x128xf32> to vector<2x32xf32>
    %143 = math.tanh %142 : vector<2x32xf32>
    %144 = vector.extract_strided_slice %141 {offsets = [0, 0], sizes = [2, 32], strides = [1, 1]} : vector<2x96xf32> to vector<2x32xf32>
    %145 = vector.extract_strided_slice %141 {offsets = [0, 32], sizes = [2, 32], strides = [1, 1]} : vector<2x96xf32> to vector<2x32xf32>
    %146 = vector.extract_strided_slice %141 {offsets = [0, 64], sizes = [2, 32], strides = [1, 1]} : vector<2x96xf32> to vector<2x32xf32>
    %147 = arith.mulf %145, %90 : vector<2x32xf32>
    %148 = arith.mulf %144, %143 : vector<2x32xf32>
    %149 = arith.addf %147, %148 : vector<2x32xf32>
    %150 = math.tanh %149 : vector<2x32xf32>
    %151 = arith.mulf %146, %150 : vector<2x32xf32>
    %152 = arith.truncf %151 : vector<2x32xf32> to vector<2x32xbf16>
    %153 = arith.index_cast %c2_i32 : i32 to index
    %c0_52 = arith.constant 0 : index
    %c0_53 = arith.constant 0 : index
    %154 = vector.load %arg5[%153, %c0_52, %c0_53] : memref<8x2x32xbf16, #tpu.memory_space<vmem>>, vector<1x2x32xbf16>
    %155 = vector.shape_cast %154 : vector<1x2x32xbf16> to vector<2x32xbf16>
    %156 = vector.shape_cast %152 : vector<2x32xbf16> to vector<1x2x32xbf16>
    tpu.vector_store %arg5[%153, %c0_52, %c0_53], %156 {strides = array<i32>} : memref<8x2x32xbf16, #tpu.memory_space<vmem>>, vector<1x2x32xbf16>,
    %157 = arith.index_cast %127 : i32 to index
    %c0_54 = arith.constant 0 : index
    %c0_55 = arith.constant 0 : index
    %158 = vector.load %arg2[%157, %c0_54, %c0_55] : memref<8x2x128xbf16, #tpu.memory_space<vmem>>, vector<1x2x128xbf16>
    %159 = vector.shape_cast %158 : vector<1x2x128xbf16> to vector<2x128xbf16>
    %160 = arith.extf %159 : vector<2x128xbf16> to vector<2x128xf32>
    %cst_56 = arith.constant dense<0.000000e+00> : vector<2x128xf32>
    %161 = tpu.matmul %122, %4, %cst_56 {dimension_numbers = #tpu.dot_dimension_numbers<[1], [0], [0], [1], [0, 0, 1, 1], [], []>} : vector<2x32xbf16>, vector<32x128xbf16>, vector<2x128xf32> -> vector<2x128xf32>
    %162 = arith.addf %160, %161 : vector<2x128xf32>
    %163 = vector.extract_strided_slice %162 {offsets = [0, 0], sizes = [2, 96], strides = [1, 1]} : vector<2x128xf32> to vector<2x96xf32>
    %cst_57 = arith.constant 5.000000e-01 : f32
    %164 = vector.broadcast %cst_57 : f32 to vector<2x96xf32>
    %165 = arith.mulf %164, %163 : vector<2x96xf32>
    %166 = math.tanh %165 : vector<2x96xf32>
    %cst_58 = arith.constant 5.000000e-01 : f32
    %167 = vector.broadcast %cst_58 : f32 to vector<2x96xf32>
    %168 = arith.mulf %167, %166 : vector<2x96xf32>
    %cst_59 = arith.constant 5.000000e-01 : f32
    %169 = vector.broadcast %cst_59 : f32 to vector<2x96xf32>
    %170 = arith.addf %168, %169 : vector<2x96xf32>
    %171 = vector.extract_strided_slice %162 {offsets = [0, 96], sizes = [2, 32], strides = [1, 1]} : vector<2x128xf32> to vector<2x32xf32>
    %172 = math.tanh %171 : vector<2x32xf32>
    %173 = vector.extract_strided_slice %170 {offsets = [0, 0], sizes = [2, 32], strides = [1, 1]} : vector<2x96xf32> to vector<2x32xf32>
    %174 = vector.extract_strided_slice %170 {offsets = [0, 32], sizes = [2, 32], strides = [1, 1]} : vector<2x96xf32> to vector<2x32xf32>
    %175 = vector.extract_strided_slice %170 {offsets = [0, 64], sizes = [2, 32], strides = [1, 1]} : vector<2x96xf32> to vector<2x32xf32>
    %176 = arith.mulf %174, %119 : vector<2x32xf32>
    %177 = arith.mulf %173, %172 : vector<2x32xf32>
    %178 = arith.addf %176, %177 : vector<2x32xf32>
    %179 = math.tanh %178 : vector<2x32xf32>
    %180 = arith.mulf %175, %179 : vector<2x32xf32>
    %181 = arith.truncf %180 : vector<2x32xf32> to vector<2x32xbf16>
    %182 = arith.index_cast %127 : i32 to index
    %c0_60 = arith.constant 0 : index
    %c0_61 = arith.constant 0 : index
    %183 = vector.load %arg6[%182, %c0_60, %c0_61] : memref<8x2x32xbf16, #tpu.memory_space<vmem>>, vector<1x2x32xbf16>
    %184 = vector.shape_cast %183 : vector<1x2x32xbf16> to vector<2x32xbf16>
    %185 = vector.shape_cast %181 : vector<2x32xbf16> to vector<1x2x32xbf16>
    tpu.vector_store %arg6[%182, %c0_60, %c0_61], %185 {strides = array<i32>} : memref<8x2x32xbf16, #tpu.memory_space<vmem>>, vector<1x2x32xbf16>,
    %c3_i32 = arith.constant 3 : i32
    %c7_i32_62 = arith.constant 7 : i32
    %186 = arith.subi %c7_i32_62, %c3_i32 : i32
    %187 = arith.index_cast %c3_i32 : i32 to index
    %c0_63 = arith.constant 0 : index
    %c0_64 = arith.constant 0 : index
    %188 = vector.load %arg1[%187, %c0_63, %c0_64] : memref<8x2x128xbf16, #tpu.memory_space<vmem>>, vector<1x2x128xbf16>
    %189 = vector.shape_cast %188 : vector<1x2x128xbf16> to vector<2x128xbf16>
    %190 = arith.extf %189 : vector<2x128xbf16> to vector<2x128xf32>
    %cst_65 = arith.constant dense<0.000000e+00> : vector<2x128xf32>
    %191 = tpu.matmul %152, %3, %cst_65 {dimension_numbers = #tpu.dot_dimension_numbers<[1], [0], [0], [1], [0, 0, 1, 1], [], []>} : vector<2x32xbf16>, vector<32x128xbf16>, vector<2x128xf32> -> vector<2x128xf32>
    %192 = arith.addf %190, %191 : vector<2x128xf32>
    %193 = vector.extract_strided_slice %192 {offsets = [0, 0], sizes = [2, 96], strides = [1, 1]} : vector<2x128xf32> to vector<2x96xf32>
    %cst_66 = arith.constant 5.000000e-01 : f32
    %194 = vector.broadcast %cst_66 : f32 to vector<2x96xf32>
    %195 = arith.mulf %194, %193 : vector<2x96xf32>
    %196 = math.tanh %195 : vector<2x96xf32>
    %cst_67 = arith.constant 5.000000e-01 : f32
    %197 = vector.broadcast %cst_67 : f32 to vector<2x96xf32>
    %198 = arith.mulf %197, %196 : vector<2x96xf32>
    %cst_68 = arith.constant 5.000000e-01 : f32
    %199 = vector.broadcast %cst_68 : f32 to vector<2x96xf32>
    %200 = arith.addf %198, %199 : vector<2x96xf32>
    %201 = vector.extract_strided_slice %192 {offsets = [0, 96], sizes = [2, 32], strides = [1, 1]} : vector<2x128xf32> to vector<2x32xf32>
    %202 = math.tanh %201 : vector<2x32xf32>
    %203 = vector.extract_strided_slice %200 {offsets = [0, 0], sizes = [2, 32], strides = [1, 1]} : vector<2x96xf32> to vector<2x32xf32>
    %204 = vector.extract_strided_slice %200 {offsets = [0, 32], sizes = [2, 32], strides = [1, 1]} : vector<2x96xf32> to vector<2x32xf32>
    %205 = vector.extract_strided_slice %200 {offsets = [0, 64], sizes = [2, 32], strides = [1, 1]} : vector<2x96xf32> to vector<2x32xf32>
    %206 = arith.mulf %204, %149 : vector<2x32xf32>
    %207 = arith.mulf %203, %202 : vector<2x32xf32>
    %208 = arith.addf %206, %207 : vector<2x32xf32>
    %209 = math.tanh %208 : vector<2x32xf32>
    %210 = arith.mulf %205, %209 : vector<2x32xf32>
    %211 = arith.truncf %210 : vector<2x32xf32> to vector<2x32xbf16>
    %212 = arith.index_cast %c3_i32 : i32 to index
    %c0_69 = arith.constant 0 : index
    %c0_70 = arith.constant 0 : index
    %213 = vector.load %arg5[%212, %c0_69, %c0_70] : memref<8x2x32xbf16, #tpu.memory_space<vmem>>, vector<1x2x32xbf16>
    %214 = vector.shape_cast %213 : vector<1x2x32xbf16> to vector<2x32xbf16>
    %215 = vector.shape_cast %211 : vector<2x32xbf16> to vector<1x2x32xbf16>
    tpu.vector_store %arg5[%212, %c0_69, %c0_70], %215 {strides = array<i32>} : memref<8x2x32xbf16, #tpu.memory_space<vmem>>, vector<1x2x32xbf16>,
    %216 = arith.index_cast %186 : i32 to index
    %c0_71 = arith.constant 0 : index
    %c0_72 = arith.constant 0 : index
    %217 = vector.load %arg2[%216, %c0_71, %c0_72] : memref<8x2x128xbf16, #tpu.memory_space<vmem>>, vector<1x2x128xbf16>
    %218 = vector.shape_cast %217 : vector<1x2x128xbf16> to vector<2x128xbf16>
    %219 = arith.extf %218 : vector<2x128xbf16> to vector<2x128xf32>
    %cst_73 = arith.constant dense<0.000000e+00> : vector<2x128xf32>
    %220 = tpu.matmul %181, %4, %cst_73 {dimension_numbers = #tpu.dot_dimension_numbers<[1], [0], [0], [1], [0, 0, 1, 1], [], []>} : vector<2x32xbf16>, vector<32x128xbf16>, vector<2x128xf32> -> vector<2x128xf32>
    %221 = arith.addf %219, %220 : vector<2x128xf32>
    %222 = vector.extract_strided_slice %221 {offsets = [0, 0], sizes = [2, 96], strides = [1, 1]} : vector<2x128xf32> to vector<2x96xf32>
    %cst_74 = arith.constant 5.000000e-01 : f32
    %223 = vector.broadcast %cst_74 : f32 to vector<2x96xf32>
    %224 = arith.mulf %223, %222 : vector<2x96xf32>
    %225 = math.tanh %224 : vector<2x96xf32>
    %cst_75 = arith.constant 5.000000e-01 : f32
    %226 = vector.broadcast %cst_75 : f32 to vector<2x96xf32>
    %227 = arith.mulf %226, %225 : vector<2x96xf32>
    %cst_76 = arith.constant 5.000000e-01 : f32
    %228 = vector.broadcast %cst_76 : f32 to vector<2x96xf32>
    %229 = arith.addf %227, %228 : vector<2x96xf32>
    %230 = vector.extract_strided_slice %221 {offsets = [0, 96], sizes = [2, 32], strides = [1, 1]} : vector<2x128xf32> to vector<2x32xf32>
    %231 = math.tanh %230 : vector<2x32xf32>
    %232 = vector.extract_strided_slice %229 {offsets = [0, 0], sizes = [2, 32], strides = [1, 1]} : vector<2x96xf32> to vector<2x32xf32>
    %233 = vector.extract_strided_slice %229 {offsets = [0, 32], sizes = [2, 32], strides = [1, 1]} : vector<2x96xf32> to vector<2x32xf32>
    %234 = vector.extract_strided_slice %229 {offsets = [0, 64], sizes = [2, 32], strides = [1, 1]} : vector<2x96xf32> to vector<2x32xf32>
    %235 = arith.mulf %233, %178 : vector<2x32xf32>
    %236 = arith.mulf %232, %231 : vector<2x32xf32>
    %237 = arith.addf %235, %236 : vector<2x32xf32>
    %238 = math.tanh %237 : vector<2x32xf32>
    %239 = arith.mulf %234, %238 : vector<2x32xf32>
    %240 = arith.truncf %239 : vector<2x32xf32> to vector<2x32xbf16>
    %241 = arith.index_cast %186 : i32 to index
    %c0_77 = arith.constant 0 : index
    %c0_78 = arith.constant 0 : index
    %242 = vector.load %arg6[%241, %c0_77, %c0_78] : memref<8x2x32xbf16, #tpu.memory_space<vmem>>, vector<1x2x32xbf16>
    %243 = vector.shape_cast %242 : vector<1x2x32xbf16> to vector<2x32xbf16>
    %244 = vector.shape_cast %240 : vector<2x32xbf16> to vector<1x2x32xbf16>
    tpu.vector_store %arg6[%241, %c0_77, %c0_78], %244 {strides = array<i32>} : memref<8x2x32xbf16, #tpu.memory_space<vmem>>, vector<1x2x32xbf16>,
    %c4_i32 = arith.constant 4 : i32
    %c7_i32_79 = arith.constant 7 : i32
    %245 = arith.subi %c7_i32_79, %c4_i32 : i32
    %246 = arith.index_cast %c4_i32 : i32 to index
    %c0_80 = arith.constant 0 : index
    %c0_81 = arith.constant 0 : index
    %247 = vector.load %arg1[%246, %c0_80, %c0_81] : memref<8x2x128xbf16, #tpu.memory_space<vmem>>, vector<1x2x128xbf16>
    %248 = vector.shape_cast %247 : vector<1x2x128xbf16> to vector<2x128xbf16>
    %249 = arith.extf %248 : vector<2x128xbf16> to vector<2x128xf32>
    %cst_82 = arith.constant dense<0.000000e+00> : vector<2x128xf32>
    %250 = tpu.matmul %211, %3, %cst_82 {dimension_numbers = #tpu.dot_dimension_numbers<[1], [0], [0], [1], [0, 0, 1, 1], [], []>} : vector<2x32xbf16>, vector<32x128xbf16>, vector<2x128xf32> -> vector<2x128xf32>
    %251 = arith.addf %249, %250 : vector<2x128xf32>
    %252 = vector.extract_strided_slice %251 {offsets = [0, 0], sizes = [2, 96], strides = [1, 1]} : vector<2x128xf32> to vector<2x96xf32>
    %cst_83 = arith.constant 5.000000e-01 : f32
    %253 = vector.broadcast %cst_83 : f32 to vector<2x96xf32>
    %254 = arith.mulf %253, %252 : vector<2x96xf32>
    %255 = math.tanh %254 : vector<2x96xf32>
    %cst_84 = arith.constant 5.000000e-01 : f32
    %256 = vector.broadcast %cst_84 : f32 to vector<2x96xf32>
    %257 = arith.mulf %256, %255 : vector<2x96xf32>
    %cst_85 = arith.constant 5.000000e-01 : f32
    %258 = vector.broadcast %cst_85 : f32 to vector<2x96xf32>
    %259 = arith.addf %257, %258 : vector<2x96xf32>
    %260 = vector.extract_strided_slice %251 {offsets = [0, 96], sizes = [2, 32], strides = [1, 1]} : vector<2x128xf32> to vector<2x32xf32>
    %261 = math.tanh %260 : vector<2x32xf32>
    %262 = vector.extract_strided_slice %259 {offsets = [0, 0], sizes = [2, 32], strides = [1, 1]} : vector<2x96xf32> to vector<2x32xf32>
    %263 = vector.extract_strided_slice %259 {offsets = [0, 32], sizes = [2, 32], strides = [1, 1]} : vector<2x96xf32> to vector<2x32xf32>
    %264 = vector.extract_strided_slice %259 {offsets = [0, 64], sizes = [2, 32], strides = [1, 1]} : vector<2x96xf32> to vector<2x32xf32>
    %265 = arith.mulf %263, %208 : vector<2x32xf32>
    %266 = arith.mulf %262, %261 : vector<2x32xf32>
    %267 = arith.addf %265, %266 : vector<2x32xf32>
    %268 = math.tanh %267 : vector<2x32xf32>
    %269 = arith.mulf %264, %268 : vector<2x32xf32>
    %270 = arith.truncf %269 : vector<2x32xf32> to vector<2x32xbf16>
    %271 = arith.index_cast %c4_i32 : i32 to index
    %c0_86 = arith.constant 0 : index
    %c0_87 = arith.constant 0 : index
    %272 = vector.load %arg5[%271, %c0_86, %c0_87] : memref<8x2x32xbf16, #tpu.memory_space<vmem>>, vector<1x2x32xbf16>
    %273 = vector.shape_cast %272 : vector<1x2x32xbf16> to vector<2x32xbf16>
    %274 = vector.shape_cast %270 : vector<2x32xbf16> to vector<1x2x32xbf16>
    tpu.vector_store %arg5[%271, %c0_86, %c0_87], %274 {strides = array<i32>} : memref<8x2x32xbf16, #tpu.memory_space<vmem>>, vector<1x2x32xbf16>,
    %275 = arith.index_cast %245 : i32 to index
    %c0_88 = arith.constant 0 : index
    %c0_89 = arith.constant 0 : index
    %276 = vector.load %arg2[%275, %c0_88, %c0_89] : memref<8x2x128xbf16, #tpu.memory_space<vmem>>, vector<1x2x128xbf16>
    %277 = vector.shape_cast %276 : vector<1x2x128xbf16> to vector<2x128xbf16>
    %278 = arith.extf %277 : vector<2x128xbf16> to vector<2x128xf32>
    %cst_90 = arith.constant dense<0.000000e+00> : vector<2x128xf32>
    %279 = tpu.matmul %240, %4, %cst_90 {dimension_numbers = #tpu.dot_dimension_numbers<[1], [0], [0], [1], [0, 0, 1, 1], [], []>} : vector<2x32xbf16>, vector<32x128xbf16>, vector<2x128xf32> -> vector<2x128xf32>
    %280 = arith.addf %278, %279 : vector<2x128xf32>
    %281 = vector.extract_strided_slice %280 {offsets = [0, 0], sizes = [2, 96], strides = [1, 1]} : vector<2x128xf32> to vector<2x96xf32>
    %cst_91 = arith.constant 5.000000e-01 : f32
    %282 = vector.broadcast %cst_91 : f32 to vector<2x96xf32>
    %283 = arith.mulf %282, %281 : vector<2x96xf32>
    %284 = math.tanh %283 : vector<2x96xf32>
    %cst_92 = arith.constant 5.000000e-01 : f32
    %285 = vector.broadcast %cst_92 : f32 to vector<2x96xf32>
    %286 = arith.mulf %285, %284 : vector<2x96xf32>
    %cst_93 = arith.constant 5.000000e-01 : f32
    %287 = vector.broadcast %cst_93 : f32 to vector<2x96xf32>
    %288 = arith.addf %286, %287 : vector<2x96xf32>
    %289 = vector.extract_strided_slice %280 {offsets = [0, 96], sizes = [2, 32], strides = [1, 1]} : vector<2x128xf32> to vector<2x32xf32>
    %290 = math.tanh %289 : vector<2x32xf32>
    %291 = vector.extract_strided_slice %288 {offsets = [0, 0], sizes = [2, 32], strides = [1, 1]} : vector<2x96xf32> to vector<2x32xf32>
    %292 = vector.extract_strided_slice %288 {offsets = [0, 32], sizes = [2, 32], strides = [1, 1]} : vector<2x96xf32> to vector<2x32xf32>
    %293 = vector.extract_strided_slice %288 {offsets = [0, 64], sizes = [2, 32], strides = [1, 1]} : vector<2x96xf32> to vector<2x32xf32>
    %294 = arith.mulf %292, %237 : vector<2x32xf32>
    %295 = arith.mulf %291, %290 : vector<2x32xf32>
    %296 = arith.addf %294, %295 : vector<2x32xf32>
    %297 = math.tanh %296 : vector<2x32xf32>
    %298 = arith.mulf %293, %297 : vector<2x32xf32>
    %299 = arith.truncf %298 : vector<2x32xf32> to vector<2x32xbf16>
    %300 = arith.index_cast %245 : i32 to index
    %c0_94 = arith.constant 0 : index
    %c0_95 = arith.constant 0 : index
    %301 = vector.load %arg6[%300, %c0_94, %c0_95] : memref<8x2x32xbf16, #tpu.memory_space<vmem>>, vector<1x2x32xbf16>
    %302 = vector.shape_cast %301 : vector<1x2x32xbf16> to vector<2x32xbf16>
    %303 = vector.shape_cast %299 : vector<2x32xbf16> to vector<1x2x32xbf16>
    tpu.vector_store %arg6[%300, %c0_94, %c0_95], %303 {strides = array<i32>} : memref<8x2x32xbf16, #tpu.memory_space<vmem>>, vector<1x2x32xbf16>,
    %c5_i32 = arith.constant 5 : i32
    %c7_i32_96 = arith.constant 7 : i32
    %304 = arith.subi %c7_i32_96, %c5_i32 : i32
    %305 = arith.index_cast %c5_i32 : i32 to index
    %c0_97 = arith.constant 0 : index
    %c0_98 = arith.constant 0 : index
    %306 = vector.load %arg1[%305, %c0_97, %c0_98] : memref<8x2x128xbf16, #tpu.memory_space<vmem>>, vector<1x2x128xbf16>
    %307 = vector.shape_cast %306 : vector<1x2x128xbf16> to vector<2x128xbf16>
    %308 = arith.extf %307 : vector<2x128xbf16> to vector<2x128xf32>
    %cst_99 = arith.constant dense<0.000000e+00> : vector<2x128xf32>
    %309 = tpu.matmul %270, %3, %cst_99 {dimension_numbers = #tpu.dot_dimension_numbers<[1], [0], [0], [1], [0, 0, 1, 1], [], []>} : vector<2x32xbf16>, vector<32x128xbf16>, vector<2x128xf32> -> vector<2x128xf32>
    %310 = arith.addf %308, %309 : vector<2x128xf32>
    %311 = vector.extract_strided_slice %310 {offsets = [0, 0], sizes = [2, 96], strides = [1, 1]} : vector<2x128xf32> to vector<2x96xf32>
    %cst_100 = arith.constant 5.000000e-01 : f32
    %312 = vector.broadcast %cst_100 : f32 to vector<2x96xf32>
    %313 = arith.mulf %312, %311 : vector<2x96xf32>
    %314 = math.tanh %313 : vector<2x96xf32>
    %cst_101 = arith.constant 5.000000e-01 : f32
    %315 = vector.broadcast %cst_101 : f32 to vector<2x96xf32>
    %316 = arith.mulf %315, %314 : vector<2x96xf32>
    %cst_102 = arith.constant 5.000000e-01 : f32
    %317 = vector.broadcast %cst_102 : f32 to vector<2x96xf32>
    %318 = arith.addf %316, %317 : vector<2x96xf32>
    %319 = vector.extract_strided_slice %310 {offsets = [0, 96], sizes = [2, 32], strides = [1, 1]} : vector<2x128xf32> to vector<2x32xf32>
    %320 = math.tanh %319 : vector<2x32xf32>
    %321 = vector.extract_strided_slice %318 {offsets = [0, 0], sizes = [2, 32], strides = [1, 1]} : vector<2x96xf32> to vector<2x32xf32>
    %322 = vector.extract_strided_slice %318 {offsets = [0, 32], sizes = [2, 32], strides = [1, 1]} : vector<2x96xf32> to vector<2x32xf32>
    %323 = vector.extract_strided_slice %318 {offsets = [0, 64], sizes = [2, 32], strides = [1, 1]} : vector<2x96xf32> to vector<2x32xf32>
    %324 = arith.mulf %322, %267 : vector<2x32xf32>
    %325 = arith.mulf %321, %320 : vector<2x32xf32>
    %326 = arith.addf %324, %325 : vector<2x32xf32>
    %327 = math.tanh %326 : vector<2x32xf32>
    %328 = arith.mulf %323, %327 : vector<2x32xf32>
    %329 = arith.truncf %328 : vector<2x32xf32> to vector<2x32xbf16>
    %330 = arith.index_cast %c5_i32 : i32 to index
    %c0_103 = arith.constant 0 : index
    %c0_104 = arith.constant 0 : index
    %331 = vector.load %arg5[%330, %c0_103, %c0_104] : memref<8x2x32xbf16, #tpu.memory_space<vmem>>, vector<1x2x32xbf16>
    %332 = vector.shape_cast %331 : vector<1x2x32xbf16> to vector<2x32xbf16>
    %333 = vector.shape_cast %329 : vector<2x32xbf16> to vector<1x2x32xbf16>
    tpu.vector_store %arg5[%330, %c0_103, %c0_104], %333 {strides = array<i32>} : memref<8x2x32xbf16, #tpu.memory_space<vmem>>, vector<1x2x32xbf16>,
    %334 = arith.index_cast %304 : i32 to index
    %c0_105 = arith.constant 0 : index
    %c0_106 = arith.constant 0 : index
    %335 = vector.load %arg2[%334, %c0_105, %c0_106] : memref<8x2x128xbf16, #tpu.memory_space<vmem>>, vector<1x2x128xbf16>
    %336 = vector.shape_cast %335 : vector<1x2x128xbf16> to vector<2x128xbf16>
    %337 = arith.extf %336 : vector<2x128xbf16> to vector<2x128xf32>
    %cst_107 = arith.constant dense<0.000000e+00> : vector<2x128xf32>
    %338 = tpu.matmul %299, %4, %cst_107 {dimension_numbers = #tpu.dot_dimension_numbers<[1], [0], [0], [1], [0, 0, 1, 1], [], []>} : vector<2x32xbf16>, vector<32x128xbf16>, vector<2x128xf32> -> vector<2x128xf32>
    %339 = arith.addf %337, %338 : vector<2x128xf32>
    %340 = vector.extract_strided_slice %339 {offsets = [0, 0], sizes = [2, 96], strides = [1, 1]} : vector<2x128xf32> to vector<2x96xf32>
    %cst_108 = arith.constant 5.000000e-01 : f32
    %341 = vector.broadcast %cst_108 : f32 to vector<2x96xf32>
    %342 = arith.mulf %341, %340 : vector<2x96xf32>
    %343 = math.tanh %342 : vector<2x96xf32>
    %cst_109 = arith.constant 5.000000e-01 : f32
    %344 = vector.broadcast %cst_109 : f32 to vector<2x96xf32>
    %345 = arith.mulf %344, %343 : vector<2x96xf32>
    %cst_110 = arith.constant 5.000000e-01 : f32
    %346 = vector.broadcast %cst_110 : f32 to vector<2x96xf32>
    %347 = arith.addf %345, %346 : vector<2x96xf32>
    %348 = vector.extract_strided_slice %339 {offsets = [0, 96], sizes = [2, 32], strides = [1, 1]} : vector<2x128xf32> to vector<2x32xf32>
    %349 = math.tanh %348 : vector<2x32xf32>
    %350 = vector.extract_strided_slice %347 {offsets = [0, 0], sizes = [2, 32], strides = [1, 1]} : vector<2x96xf32> to vector<2x32xf32>
    %351 = vector.extract_strided_slice %347 {offsets = [0, 32], sizes = [2, 32], strides = [1, 1]} : vector<2x96xf32> to vector<2x32xf32>
    %352 = vector.extract_strided_slice %347 {offsets = [0, 64], sizes = [2, 32], strides = [1, 1]} : vector<2x96xf32> to vector<2x32xf32>
    %353 = arith.mulf %351, %296 : vector<2x32xf32>
    %354 = arith.mulf %350, %349 : vector<2x32xf32>
    %355 = arith.addf %353, %354 : vector<2x32xf32>
    %356 = math.tanh %355 : vector<2x32xf32>
    %357 = arith.mulf %352, %356 : vector<2x32xf32>
    %358 = arith.truncf %357 : vector<2x32xf32> to vector<2x32xbf16>
    %359 = arith.index_cast %304 : i32 to index
    %c0_111 = arith.constant 0 : index
    %c0_112 = arith.constant 0 : index
    %360 = vector.load %arg6[%359, %c0_111, %c0_112] : memref<8x2x32xbf16, #tpu.memory_space<vmem>>, vector<1x2x32xbf16>
    %361 = vector.shape_cast %360 : vector<1x2x32xbf16> to vector<2x32xbf16>
    %362 = vector.shape_cast %358 : vector<2x32xbf16> to vector<1x2x32xbf16>
    tpu.vector_store %arg6[%359, %c0_111, %c0_112], %362 {strides = array<i32>} : memref<8x2x32xbf16, #tpu.memory_space<vmem>>, vector<1x2x32xbf16>,
    %c6_i32 = arith.constant 6 : i32
    %c7_i32_113 = arith.constant 7 : i32
    %363 = arith.subi %c7_i32_113, %c6_i32 : i32
    %364 = arith.index_cast %c6_i32 : i32 to index
    %c0_114 = arith.constant 0 : index
    %c0_115 = arith.constant 0 : index
    %365 = vector.load %arg1[%364, %c0_114, %c0_115] : memref<8x2x128xbf16, #tpu.memory_space<vmem>>, vector<1x2x128xbf16>
    %366 = vector.shape_cast %365 : vector<1x2x128xbf16> to vector<2x128xbf16>
    %367 = arith.extf %366 : vector<2x128xbf16> to vector<2x128xf32>
    %cst_116 = arith.constant dense<0.000000e+00> : vector<2x128xf32>
    %368 = tpu.matmul %329, %3, %cst_116 {dimension_numbers = #tpu.dot_dimension_numbers<[1], [0], [0], [1], [0, 0, 1, 1], [], []>} : vector<2x32xbf16>, vector<32x128xbf16>, vector<2x128xf32> -> vector<2x128xf32>
    %369 = arith.addf %367, %368 : vector<2x128xf32>
    %370 = vector.extract_strided_slice %369 {offsets = [0, 0], sizes = [2, 96], strides = [1, 1]} : vector<2x128xf32> to vector<2x96xf32>
    %cst_117 = arith.constant 5.000000e-01 : f32
    %371 = vector.broadcast %cst_117 : f32 to vector<2x96xf32>
    %372 = arith.mulf %371, %370 : vector<2x96xf32>
    %373 = math.tanh %372 : vector<2x96xf32>
    %cst_118 = arith.constant 5.000000e-01 : f32
    %374 = vector.broadcast %cst_118 : f32 to vector<2x96xf32>
    %375 = arith.mulf %374, %373 : vector<2x96xf32>
    %cst_119 = arith.constant 5.000000e-01 : f32
    %376 = vector.broadcast %cst_119 : f32 to vector<2x96xf32>
    %377 = arith.addf %375, %376 : vector<2x96xf32>
    %378 = vector.extract_strided_slice %369 {offsets = [0, 96], sizes = [2, 32], strides = [1, 1]} : vector<2x128xf32> to vector<2x32xf32>
    %379 = math.tanh %378 : vector<2x32xf32>
    %380 = vector.extract_strided_slice %377 {offsets = [0, 0], sizes = [2, 32], strides = [1, 1]} : vector<2x96xf32> to vector<2x32xf32>
    %381 = vector.extract_strided_slice %377 {offsets = [0, 32], sizes = [2, 32], strides = [1, 1]} : vector<2x96xf32> to vector<2x32xf32>
    %382 = vector.extract_strided_slice %377 {offsets = [0, 64], sizes = [2, 32], strides = [1, 1]} : vector<2x96xf32> to vector<2x32xf32>
    %383 = arith.mulf %381, %326 : vector<2x32xf32>
    %384 = arith.mulf %380, %379 : vector<2x32xf32>
    %385 = arith.addf %383, %384 : vector<2x32xf32>
    %386 = math.tanh %385 : vector<2x32xf32>
    %387 = arith.mulf %382, %386 : vector<2x32xf32>
    %388 = arith.truncf %387 : vector<2x32xf32> to vector<2x32xbf16>
    %389 = arith.index_cast %c6_i32 : i32 to index
    %c0_120 = arith.constant 0 : index
    %c0_121 = arith.constant 0 : index
    %390 = vector.load %arg5[%389, %c0_120, %c0_121] : memref<8x2x32xbf16, #tpu.memory_space<vmem>>, vector<1x2x32xbf16>
    %391 = vector.shape_cast %390 : vector<1x2x32xbf16> to vector<2x32xbf16>
    %392 = vector.shape_cast %388 : vector<2x32xbf16> to vector<1x2x32xbf16>
    tpu.vector_store %arg5[%389, %c0_120, %c0_121], %392 {strides = array<i32>} : memref<8x2x32xbf16, #tpu.memory_space<vmem>>, vector<1x2x32xbf16>,
    %393 = arith.index_cast %363 : i32 to index
    %c0_122 = arith.constant 0 : index
    %c0_123 = arith.constant 0 : index
    %394 = vector.load %arg2[%393, %c0_122, %c0_123] : memref<8x2x128xbf16, #tpu.memory_space<vmem>>, vector<1x2x128xbf16>
    %395 = vector.shape_cast %394 : vector<1x2x128xbf16> to vector<2x128xbf16>
    %396 = arith.extf %395 : vector<2x128xbf16> to vector<2x128xf32>
    %cst_124 = arith.constant dense<0.000000e+00> : vector<2x128xf32>
    %397 = tpu.matmul %358, %4, %cst_124 {dimension_numbers = #tpu.dot_dimension_numbers<[1], [0], [0], [1], [0, 0, 1, 1], [], []>} : vector<2x32xbf16>, vector<32x128xbf16>, vector<2x128xf32> -> vector<2x128xf32>
    %398 = arith.addf %396, %397 : vector<2x128xf32>
    %399 = vector.extract_strided_slice %398 {offsets = [0, 0], sizes = [2, 96], strides = [1, 1]} : vector<2x128xf32> to vector<2x96xf32>
    %cst_125 = arith.constant 5.000000e-01 : f32
    %400 = vector.broadcast %cst_125 : f32 to vector<2x96xf32>
    %401 = arith.mulf %400, %399 : vector<2x96xf32>
    %402 = math.tanh %401 : vector<2x96xf32>
    %cst_126 = arith.constant 5.000000e-01 : f32
    %403 = vector.broadcast %cst_126 : f32 to vector<2x96xf32>
    %404 = arith.mulf %403, %402 : vector<2x96xf32>
    %cst_127 = arith.constant 5.000000e-01 : f32
    %405 = vector.broadcast %cst_127 : f32 to vector<2x96xf32>
    %406 = arith.addf %404, %405 : vector<2x96xf32>
    %407 = vector.extract_strided_slice %398 {offsets = [0, 96], sizes = [2, 32], strides = [1, 1]} : vector<2x128xf32> to vector<2x32xf32>
    %408 = math.tanh %407 : vector<2x32xf32>
    %409 = vector.extract_strided_slice %406 {offsets = [0, 0], sizes = [2, 32], strides = [1, 1]} : vector<2x96xf32> to vector<2x32xf32>
    %410 = vector.extract_strided_slice %406 {offsets = [0, 32], sizes = [2, 32], strides = [1, 1]} : vector<2x96xf32> to vector<2x32xf32>
    %411 = vector.extract_strided_slice %406 {offsets = [0, 64], sizes = [2, 32], strides = [1, 1]} : vector<2x96xf32> to vector<2x32xf32>
    %412 = arith.mulf %410, %355 : vector<2x32xf32>
    %413 = arith.mulf %409, %408 : vector<2x32xf32>
    %414 = arith.addf %412, %413 : vector<2x32xf32>
    %415 = math.tanh %414 : vector<2x32xf32>
    %416 = arith.mulf %411, %415 : vector<2x32xf32>
    %417 = arith.truncf %416 : vector<2x32xf32> to vector<2x32xbf16>
    %418 = arith.index_cast %363 : i32 to index
    %c0_128 = arith.constant 0 : index
    %c0_129 = arith.constant 0 : index
    %419 = vector.load %arg6[%418, %c0_128, %c0_129] : memref<8x2x32xbf16, #tpu.memory_space<vmem>>, vector<1x2x32xbf16>
    %420 = vector.shape_cast %419 : vector<1x2x32xbf16> to vector<2x32xbf16>
    %421 = vector.shape_cast %417 : vector<2x32xbf16> to vector<1x2x32xbf16>
    tpu.vector_store %arg6[%418, %c0_128, %c0_129], %421 {strides = array<i32>} : memref<8x2x32xbf16, #tpu.memory_space<vmem>>, vector<1x2x32xbf16>,
    %c7_i32_130 = arith.constant 7 : i32
    %c7_i32_131 = arith.constant 7 : i32
    %422 = arith.subi %c7_i32_131, %c7_i32_130 : i32
    %423 = arith.index_cast %c7_i32_130 : i32 to index
    %c0_132 = arith.constant 0 : index
    %c0_133 = arith.constant 0 : index
    %424 = vector.load %arg1[%423, %c0_132, %c0_133] : memref<8x2x128xbf16, #tpu.memory_space<vmem>>, vector<1x2x128xbf16>
    %425 = vector.shape_cast %424 : vector<1x2x128xbf16> to vector<2x128xbf16>
    %426 = arith.extf %425 : vector<2x128xbf16> to vector<2x128xf32>
    %cst_134 = arith.constant dense<0.000000e+00> : vector<2x128xf32>
    %427 = tpu.matmul %388, %3, %cst_134 {dimension_numbers = #tpu.dot_dimension_numbers<[1], [0], [0], [1], [0, 0, 1, 1], [], []>} : vector<2x32xbf16>, vector<32x128xbf16>, vector<2x128xf32> -> vector<2x128xf32>
    %428 = arith.addf %426, %427 : vector<2x128xf32>
    %429 = vector.extract_strided_slice %428 {offsets = [0, 0], sizes = [2, 96], strides = [1, 1]} : vector<2x128xf32> to vector<2x96xf32>
    %cst_135 = arith.constant 5.000000e-01 : f32
    %430 = vector.broadcast %cst_135 : f32 to vector<2x96xf32>
    %431 = arith.mulf %430, %429 : vector<2x96xf32>
    %432 = math.tanh %431 : vector<2x96xf32>
    %cst_136 = arith.constant 5.000000e-01 : f32
    %433 = vector.broadcast %cst_136 : f32 to vector<2x96xf32>
    %434 = arith.mulf %433, %432 : vector<2x96xf32>
    %cst_137 = arith.constant 5.000000e-01 : f32
    %435 = vector.broadcast %cst_137 : f32 to vector<2x96xf32>
    %436 = arith.addf %434, %435 : vector<2x96xf32>
    %437 = vector.extract_strided_slice %428 {offsets = [0, 96], sizes = [2, 32], strides = [1, 1]} : vector<2x128xf32> to vector<2x32xf32>
    %438 = math.tanh %437 : vector<2x32xf32>
    %439 = vector.extract_strided_slice %436 {offsets = [0, 0], sizes = [2, 32], strides = [1, 1]} : vector<2x96xf32> to vector<2x32xf32>
    %440 = vector.extract_strided_slice %436 {offsets = [0, 32], sizes = [2, 32], strides = [1, 1]} : vector<2x96xf32> to vector<2x32xf32>
    %441 = vector.extract_strided_slice %436 {offsets = [0, 64], sizes = [2, 32], strides = [1, 1]} : vector<2x96xf32> to vector<2x32xf32>
    %442 = arith.mulf %440, %385 : vector<2x32xf32>
    %443 = arith.mulf %439, %438 : vector<2x32xf32>
    %444 = arith.addf %442, %443 : vector<2x32xf32>
    %445 = math.tanh %444 : vector<2x32xf32>
    %446 = arith.mulf %441, %445 : vector<2x32xf32>
    %447 = arith.truncf %446 : vector<2x32xf32> to vector<2x32xbf16>
    %448 = arith.index_cast %c7_i32_130 : i32 to index
    %c0_138 = arith.constant 0 : index
    %c0_139 = arith.constant 0 : index
    %449 = vector.load %arg5[%448, %c0_138, %c0_139] : memref<8x2x32xbf16, #tpu.memory_space<vmem>>, vector<1x2x32xbf16>
    %450 = vector.shape_cast %449 : vector<1x2x32xbf16> to vector<2x32xbf16>
    %451 = vector.shape_cast %447 : vector<2x32xbf16> to vector<1x2x32xbf16>
    tpu.vector_store %arg5[%448, %c0_138, %c0_139], %451 {strides = array<i32>} : memref<8x2x32xbf16, #tpu.memory_space<vmem>>, vector<1x2x32xbf16>,
    %452 = arith.index_cast %422 : i32 to index
    %c0_140 = arith.constant 0 : index
    %c0_141 = arith.constant 0 : index
    %453 = vector.load %arg2[%452, %c0_140, %c0_141] : memref<8x2x128xbf16, #tpu.memory_space<vmem>>, vector<1x2x128xbf16>
    %454 = vector.shape_cast %453 : vector<1x2x128xbf16> to vector<2x128xbf16>
    %455 = arith.extf %454 : vector<2x128xbf16> to vector<2x128xf32>
    %cst_142 = arith.constant dense<0.000000e+00> : vector<2x128xf32>
    %456 = tpu.matmul %417, %4, %cst_142 {dimension_numbers = #tpu.dot_dimension_numbers<[1], [0], [0], [1], [0, 0, 1, 1], [], []>} : vector<2x32xbf16>, vector<32x128xbf16>, vector<2x128xf32> -> vector<2x128xf32>
    %457 = arith.addf %455, %456 : vector<2x128xf32>
    %458 = vector.extract_strided_slice %457 {offsets = [0, 0], sizes = [2, 96], strides = [1, 1]} : vector<2x128xf32> to vector<2x96xf32>
    %cst_143 = arith.constant 5.000000e-01 : f32
    %459 = vector.broadcast %cst_143 : f32 to vector<2x96xf32>
    %460 = arith.mulf %459, %458 : vector<2x96xf32>
    %461 = math.tanh %460 : vector<2x96xf32>
    %cst_144 = arith.constant 5.000000e-01 : f32
    %462 = vector.broadcast %cst_144 : f32 to vector<2x96xf32>
    %463 = arith.mulf %462, %461 : vector<2x96xf32>
    %cst_145 = arith.constant 5.000000e-01 : f32
    %464 = vector.broadcast %cst_145 : f32 to vector<2x96xf32>
    %465 = arith.addf %463, %464 : vector<2x96xf32>
    %466 = vector.extract_strided_slice %457 {offsets = [0, 96], sizes = [2, 32], strides = [1, 1]} : vector<2x128xf32> to vector<2x32xf32>
    %467 = math.tanh %466 : vector<2x32xf32>
    %468 = vector.extract_strided_slice %465 {offsets = [0, 0], sizes = [2, 32], strides = [1, 1]} : vector<2x96xf32> to vector<2x32xf32>
    %469 = vector.extract_strided_slice %465 {offsets = [0, 32], sizes = [2, 32], strides = [1, 1]} : vector<2x96xf32> to vector<2x32xf32>
    %470 = vector.extract_strided_slice %465 {offsets = [0, 64], sizes = [2, 32], strides = [1, 1]} : vector<2x96xf32> to vector<2x32xf32>
    %471 = arith.mulf %469, %414 : vector<2x32xf32>
    %472 = arith.mulf %468, %467 : vector<2x32xf32>
    %473 = arith.addf %471, %472 : vector<2x32xf32>
    %474 = math.tanh %473 : vector<2x32xf32>
    %475 = arith.mulf %470, %474 : vector<2x32xf32>
    %476 = arith.truncf %475 : vector<2x32xf32> to vector<2x32xbf16>
    %477 = arith.index_cast %422 : i32 to index
    %c0_146 = arith.constant 0 : index
    %c0_147 = arith.constant 0 : index
    %478 = vector.load %arg6[%477, %c0_146, %c0_147] : memref<8x2x32xbf16, #tpu.memory_space<vmem>>, vector<1x2x32xbf16>
    %479 = vector.shape_cast %478 : vector<1x2x32xbf16> to vector<2x32xbf16>
    %480 = vector.shape_cast %476 : vector<2x32xbf16> to vector<1x2x32xbf16>
    tpu.vector_store %arg6[%477, %c0_146, %c0_147], %480 {strides = array<i32>} : memref<8x2x32xbf16, #tpu.memory_space<vmem>>, vector<1x2x32xbf16>,
    %c8_i32 = arith.constant 8 : i32
    %c0_148 = arith.constant 0 : index
    %c0_149 = arith.constant 0 : index
    %481 = vector.load %arg7[%c0_148, %c0_149] : memref<2x32xbf16, #tpu.memory_space<vmem>>, vector<2x32xbf16>
    tpu.vector_store %arg7[%c0_148, %c0_149], %447 {strides = array<i32>} : memref<2x32xbf16, #tpu.memory_space<vmem>>, vector<2x32xbf16>,
    %c0_150 = arith.constant 0 : index
    %c0_151 = arith.constant 0 : index
    %482 = vector.load %arg8[%c0_150, %c0_151] : memref<2x32xf32, #tpu.memory_space<vmem>>, vector<2x32xf32>
    tpu.vector_store %arg8[%c0_150, %c0_151], %444 {strides = array<i32>} : memref<2x32xf32, #tpu.memory_space<vmem>>, vector<2x32xf32>,
    %c0_152 = arith.constant 0 : index
    %c0_153 = arith.constant 0 : index
    %483 = vector.load %arg9[%c0_152, %c0_153] : memref<2x32xbf16, #tpu.memory_space<vmem>>, vector<2x32xbf16>
    tpu.vector_store %arg9[%c0_152, %c0_153], %476 {strides = array<i32>} : memref<2x32xbf16, #tpu.memory_space<vmem>>, vector<2x32xbf16>,
    %c0_154 = arith.constant 0 : index
    %c0_155 = arith.constant 0 : index
    %484 = vector.load %arg10[%c0_154, %c0_155] : memref<2x32xf32, #tpu.memory_space<vmem>>, vector<2x32xf32>
    tpu.vector_store %arg10[%c0_154, %c0_155], %473 {strides = array<i32>} : memref<2x32xf32, #tpu.memory_space<vmem>>, vector<2x32xf32>,
    return
  }
  func.func @transform_0(%arg0: i32) -> (i32, i32, i32) {
    %c0_i32 = arith.constant 0 : i32
    %c0_i32_0 = arith.constant 0 : i32
    %c0_i32_1 = arith.constant 0 : i32
    return %arg0, %c0_i32, %c0_i32_0 : i32, i32, i32
  }
  func.func @transform_1(%arg0: i32) -> (i32, i32, i32) {
    %c0_i32 = arith.constant 0 : i32
    %0 = arith.subi %c0_i32, %arg0 : i32
    %c0_i32_0 = arith.constant 0 : i32
    %c0_i32_1 = arith.constant 0 : i32
    %c0_i32_2 = arith.constant 0 : i32
    return %0, %c0_i32_0, %c0_i32_1 : i32, i32, i32
  }
  func.func @transform_2(%arg0: i32) -> (i32, i32) {
    %c0_i32 = arith.constant 0 : i32
    %c0_i32_0 = arith.constant 0 : i32
    %c0_i32_1 = arith.constant 0 : i32
    return %c0_i32, %c0_i32_0 : i32, i32
  }
  func.func @transform_3(%arg0: i32) -> (i32, i32) {
    %c0_i32 = arith.constant 0 : i32
    %c0_i32_0 = arith.constant 0 : i32
    %c0_i32_1 = arith.constant 0 : i32
    return %c0_i32, %c0_i32_0 : i32, i32
  }
  func.func @transform_4(%arg0: i32) -> (i32, i32, i32) {
    %c0_i32 = arith.constant 0 : i32
    %c0_i32_0 = arith.constant 0 : i32
    %c0_i32_1 = arith.constant 0 : i32
    return %arg0, %c0_i32, %c0_i32_0 : i32, i32, i32
  }
  func.func @transform_5(%arg0: i32) -> (i32, i32, i32) {
    %c0_i32 = arith.constant 0 : i32
    %0 = arith.subi %c0_i32, %arg0 : i32
    %c0_i32_0 = arith.constant 0 : i32
    %c0_i32_1 = arith.constant 0 : i32
    %c0_i32_2 = arith.constant 0 : i32
    return %0, %c0_i32_0, %c0_i32_1 : i32, i32, i32
  }
}

</mosaic_0001>

<bundles_post_ra>
// kernel: bidirectional_forward.5
= control target key start
LH: loop header
LB: loop body
LE: loop exit
PB: predicated region body
PF: predicated region fallthrough
CT: control target
= control target key end

     0   :  { %v248_v1 = vmov 0.0   ;;  %vm249_vm0 = vmmov 0   ;;  %vm51_vm1 = vcmask 261120   ;;  %s307_s0 = inlined_call_operand.vmem [shape: bf16[16,32], index: 0, kind: input, shape index: {}]   ;;  %s308_s1 = inlined_call_operand.vmem [shape: bf16[16,32], index: 1, kind: input, shape index: {}]   ;;  %s309_s2 = inlined_call_operand.vmem [shape: bf16[32,128], index: 2, kind: input, shape index: {}]   ;;  %s310_s3 = inlined_call_operand.vmem [shape: bf16[32,128], index: 3, kind: input, shape index: {}]   ;;  %s311_s4 = inlined_call_operand.vmem [shape: f32[1,128], index: 4, kind: input, shape index: {}]   ;;  %s312_s5 = inlined_call_operand.hbm [shape: f32[16,128], index: 5, kind: output, shape index: {}]  }
   0x1   :  { %v220_v0 = vld [vmem:[%s310_s3 + $0x8] sm:$0xff]   ;;  %199 = vmatprep.subr.bf16.mxu0 %v248_v1  ;;  %207 = vmatprep.subr.bf16.mxu1 %v248_v1  ;;  %v222_v3 = vld [vmem:[%s310_s3] sm:$0xff]  }
   0x2   :  { %v221_v2 = vld [vmem:[%s309_s2 + $0x8] sm:$0xff]   ;;  %200 = vmatpush3.bf16.msra.mxu0 %v220_v0  ;;  %203 = vmatprep.mubr.msk.bf16.mxu0 %vm249_vm0, %v248_v1  ;;  %v223_v4 = vld [vmem:[%s309_s2] sm:$0xff]  }
   0x3   :  { %208 = vmatpush3.bf16.msra.mxu1 %v221_v2  ;;  %201 = vmatprep.subr.bf16.mxu0 %v248_v1  ;;  %v224_v5 = vld [vmem:[%s308_s1] sm:$0xff]  }
   0x4   :  { %209 = vmatprep.subr.bf16.mxu1 %v248_v1  ;;  %211 = vmatprep.mubr.msk.bf16.mxu1 %vm249_vm0, %v248_v1  ;;  %v225_v6 = vld [vmem:[%s307_s0] sm:$0xff]  }
   0x6   :  { %202 = vmatpush3.bf16.msra.mxu0 %v222_v3 }
   0x7   :  { %10 = vsyncpa [#allocation3], 0  ;;  %210 = vmatpush3.bf16.msra.mxu1 %v223_v4  ;;  %v192_v9 = vld [vmem:[%s311_s4] ss:$0 sm:$0xff]  ;;  %s250_s1 = smov [#allocation2]  }
   0x8   :  { %s173_s30 = sshll.u32 %s250_s1, 4  ;;  %s174_s30 = int_to_ptr.vmem [resolvable:$true] %s173_s30 }
   0x9   :  { %204 = vmatmul.mubr.msk.bf16.vlgmr.msra.gmra.mxu0 %vm51_vm1, %v224_v5  ;;  %s226_s0 = scalar_lea.vmem %s174_s30, 256  ;;  %p231_p1 = scmp.lt.s32.totalorder %s174_s30, %s174_s30 }
   0xa   :  { %212 = vmatmul.mubr.msk.bf16.vlgmr.msra.gmra.mxu1 %vm51_vm1, %v225_v6  ;;  %p227_p0 = scmp.ne.s32.totalorder %s174_s30, %s226_s0  ;;  %p232_p2 = scmp.lt.s32.totalorder %s226_s0, %s226_s0 }
   0xc   :  { %p233_p3 = por %p232_p2, %p231_p1 }
   0xe   :  { %p234_p4 = pnand %p233_p3, %p227_p0 }
  0xc9   :  { %v89_v7 = vpop.f32.mrf.mxu0 }
  0xca   :  { %v150_v8 = vpop.f32.mrf.mxu1 }
  0xcb   :  { %v151_v10 = vadd.f32 %v150_v8, %v89_v7  ;;  %v205_v11 = vpop.f32.mrf.mxu0 }
  0xcc   :  { %v213_v12 = vpop.f32.mrf.mxu1 }
  0xcd   :  { %v164_v13 = vadd.f32 %v192_v9, %v151_v10  ;;  %v92_v14 = vpop.f32.mrf.mxu0 }
  0xce   :  { %v153_v15 = vpop.f32.mrf.mxu1 }
  0xcf   :  { %166 = vst [vmem:[#allocation2] sm:$0xff] %v164_v13  ;;  %v154_v16 = vadd.f32 %v153_v15, %v92_v14  ;;  %v206_v17 = vpop.f32.mrf.mxu0 }
  0xd0   :  { %v214_v18 = vpop.f32.mrf.mxu1 }
  0xd1   :  { %v165_v19 = vadd.f32 %v192_v9, %v154_v16 }
  0xd3   :  { %167 = vst [vmem:[#allocation2 + $0x8] sm:$0xff] %v165_v19 }
  0xd4   :  { %237 = shalt.err (!%p234_p4)
}
  0xd5   :  { %s251_s4 = smov 128   ;;  %s252_s6 = smov 8  }
  0xd6   :  { %179 = dma.vmem_to_hbm [thread:$0]  %s174_s30, 256, %s312_s5, [#allocation3], %s251_s4, %s251_s4, %s252_s6  }
  0xd7   :  { %246 = dma.done.wait [#allocation3], 256  }
  0xd8   :  { %247 = vsyncadd [#allocation3], 4294967040 }
  0xd9   :  { %183 = vsyncpa [#allocation3], 1 }

// kernel: bidirectional_forward.3
= control target key start
LH: loop header
LB: loop body
LE: loop exit
PB: predicated region body
PF: predicated region fallthrough
CT: control target
= control target key end

     0   :  { %10 = vsyncpa [#allocation3], 0  ;;  %s267_s0 = inlined_call_operand.hbm [shape: f32[16,16], index: 0, kind: input, shape index: {}]   ;;  %s268_s1 = inlined_call_operand.hbm [shape: bf16[16,256], index: 1, kind: input, shape index: {}]   ;;  %s269_s2 = inlined_call_operand.vmem [shape: f32[1,256], index: 2, kind: input, shape index: {}]   ;;  %s270_s3 = inlined_call_operand.vmem [shape: bf16[16,128], index: 3, kind: output, shape index: {0}]   ;;  %s271_s4 = inlined_call_operand.vmem [shape: bf16[16,128], index: 4, kind: output, shape index: {1}]  }
   0x1   :  { %11 = vsyncpa [#allocation5], 0  ;;  %s222_s15 = smov [#allocation2]  }
   0x2   :  { %s17_s16 = sshll.u32 %s222_s15, 4  ;;  %s18_s16 = int_to_ptr.vmem [resolvable:$true] %s17_s16 }
   0x3   :  { %s186_s17 = scalar_lea.vmem %s18_s16, 256  ;;  %p191_p1 = scmp.lt.s32.totalorder %s18_s16, %s18_s16 }
   0x4   :  { %p187_p0 = scmp.ne.s32.totalorder %s18_s16, %s186_s17  ;;  %p192_p2 = scmp.lt.s32.totalorder %s186_s17, %s186_s17 }
   0x6   :  { %p193_p3 = por %p192_p2, %p191_p1 }
   0x8   :  { %p194_p4 = pnand %p193_p3, %p187_p0 }
   0xa   :  { %197 = shalt.err (!%p194_p4)
}
   0xb   :  { %s223_s18 = smov 128   ;;  %s224_s19 = smov 8  }
   0xc   :  { %23 = dma.hbm_to_vmem [thread:$0]  %s267_s0, 256, %s18_s16, [#allocation3], %s223_s18, %s223_s18, %s224_s19  }
   0xd   :  { %s225_s22 = smov [#allocation4]  }
   0xe   :  { %s29_s23 = sshll.u32 %s225_s22, 4  ;;  %s30_s23 = int_to_ptr.vmem [resolvable:$true] %s29_s23 }
   0xf   :  { %s206_s24 = scalar_lea.vmem %s30_s23, 256  ;;  %p211_p6 = scmp.lt.s32.totalorder %s30_s23, %s30_s23 }
  0x10   :  { %p207_p5 = scmp.ne.s32.totalorder %s30_s23, %s206_s24  ;;  %p212_p7 = scmp.lt.s32.totalorder %s206_s24, %s206_s24 }
  0x12   :  { %p213_p8 = por %p212_p7, %p211_p6 }
  0x14   :  { %p214_p9 = pnand %p213_p8, %p207_p5 }
  0x16   :  { %217 = shalt.err (!%p214_p9)
}
  0x17   :  { %35 = dma.hbm_to_vmem [thread:$0]  %s268_s1, 256, %s30_s23, [#allocation5], %s223_s18, %s223_s18, %s224_s19  }
  0x18   :  { %218 = dma.done.wait [#allocation3], 256  }
  0x19   :  { %219 = vsyncadd [#allocation3], 4294967040 }
  0x1a   :  { %220 = dma.done.wait [#allocation5], 256  }
  0x1b   :  { %221 = vsyncadd [#allocation5], 4294967040  ;;  %v226_v0 = vmov 0   ;;  %v175_v1 = vld [vmem:[#allocation4 + $0x4] ss:$8 sps:$4 sm:$0xff]   ;;  %v45_v3 = vld [vmem:[#allocation2] sm:$0xff]  ;;  %v52_v6 = vlaneseq }
  0x1c   :  { %108 = vmatprep.mubr.bf16.mxu0 %v226_v0  ;;  %v177_v2 = vld [vmem:[#allocation4] ss:$8 sps:$4 sm:$0xff]   ;;  %v46_v4 = vld [vmem:[#allocation2 + $0x8] sm:$0xff]  ;;  %90 = vmatprep.subr.bf16.mxu0 %v175_v1  ;;  %vm72_vm0 = vcmask 130048   ;;  %v50_v9 = vld [vmem:[%s269_s2] sm:$0x3] }
  0x1d   :  { %v47_v5 = vpack.c.bf16 %v46_v4, %v45_v3  ;;  %91 = vmatpush1.bf16.msra.mxu0 %v177_v2  ;;  %v53_v7 = vshrl.u32 %v52_v6, 7 }
  0x1f   :  { %v54_v8 = vsub.s32 0, %v53_v7  ;;  %v58_v10 = vsub.s32 1, %v53_v7 }
  0x20   :  { %151 = vmatmul.mubr.msk.bf16.vlgmr.msra.gmra.mxu0 %vm72_vm0, %v47_v5 }
  0x21   :  { %v55_v12 = vrot.slane %v50_v9, %v54_v8  ;;  %v59_v14 = vrot.slane %v50_v9, %v58_v10 }
  0xe0   :  { %v110_v11 = vpop.f32.mrf.mxu0 }
  0xe1   :  { %v111_v16 = vadd.f32 %v110_v11, %v55_v12 }
  0xe2   :  { %v112_v13 = vpop.f32.mrf.mxu0 }
  0xe3   :  { %v113_v19 = vadd.f32 %v112_v13, %v59_v14 }
  0xe4   :  { %v114_v15 = vpop.f32.mrf.mxu0 }
  0xe5   :  { %v115_v17 = vadd.f32 %v114_v15, %v55_v12 }
  0xe6   :  { %v116_v18 = vpop.f32.mrf.mxu0 }
  0xe7   :  { %v163_v20 = vpack.c.bf16 %v115_v17, %v111_v16  ;;  %v117_v21 = vadd.f32 %v116_v18, %v59_v14 }
  0xe9   :  { %164 = vst [vmem:[%s270_s3] sm:$0xff] %v163_v20   ;;  %v168_v22 = vpack.c.bf16 %v117_v21, %v113_v19 }
  0xeb   :  { %169 = vst [vmem:[%s271_s4] sm:$0xff] %v168_v22  }
  0xec   :  { %147 = vsyncpa [#allocation3], 1 }
  0xed   :  { %148 = vsyncpa [#allocation5], 1 }

// kernel: bidirectional_forward.4
= control target key start
LH: loop header
LB: loop body
LE: loop exit
PB: predicated region body
PF: predicated region fallthrough
CT: control target
= control target key end

     0   :  { %vm55_vm0 = vcmask 253952   ;;  %v1973_v0 = vmov 0.0   ;;  %v1974_v2 = vmov 0   ;;  %vm1975_vm1 = vmmov 0   ;;  %s1977_s29 = smov 64   ;;  %s1980_s15 = smov 96   ;;  %s2501_s2 = inlined_call_operand.vmem [shape: bf16[32,128], index: 2, kind: input, shape index: {}]   ;;  %s2502_s3 = inlined_call_operand.vmem [shape: bf16[32,128], index: 3, kind: input, shape index: {}]   ;;  %s2503_s0 = inlined_call_operand.vmem [shape: bf16[8,2,128], index: 0, kind: input, shape index: {}]   ;;  %s2504_s1 = inlined_call_operand.vmem [shape: bf16[8,2,128], index: 1, kind: input, shape index: {}]   ;;  %s2505_s4 = inlined_call_operand.vmem [shape: bf16[8,2,32], index: 4, kind: output, shape index: {0}]   ;;  %s2506_s5 = inlined_call_operand.vmem [shape: bf16[8,2,32], index: 5, kind: output, shape index: {1}]  }
   0x1   :  { %1737 = vmatprep.subr.bf16.mxu0 %v1973_v0  ;;  %1745 = vmatprep.subr.bf16.mxu1 %v1973_v0  ;;  %v2016_v1 = vld [vmem:[%s2501_s2 + $0x8] sm:$0xff]   ;;  %56 = vst.msk [vmem:[#allocation2] sm:$0x1] %vm55_vm0, %v1974_v2  ;;  %59 = vst.msk [vmem:[#allocation4] sm:$0x1] %vm55_vm0, %v1974_v2  ;;  %vm57_vm2 = vcmask 254976  }
   0x2   :  { %v2023_v3 = vld [vmem:[%s2502_s3 + $0x8] sm:$0xff]   ;;  %1741 = vmatprep.mubr.msk.bf16.mxu0 %vm1975_vm1, %v1973_v0  ;;  %1749 = vmatprep.mubr.msk.bf16.mxu1 %vm1975_vm1, %v1973_v0  ;;  %v2033_v4 = vld [vmem:[%s2501_s2] sm:$0xff]   ;;  %58 = vst.msk [vmem:[#allocation3] sm:$0x3] %vm57_vm2, %v1973_v0  ;;  %60 = vst.msk [vmem:[#allocation5] sm:$0x3] %vm57_vm2, %v1973_v0 }
   0x3   :  { %1738 = vmatpush3.bf16.msra.mxu0 %v2016_v1  ;;  %1746 = vmatpush3.bf16.msra.mxu1 %v2023_v3  ;;  %v2044_v5 = vld [vmem:[%s2502_s3] sm:$0xff]   ;;  %vm87_vm3 = vcmask 261120   ;;  %s1976_s2 = smov 32  }
   0x4   :  { %1739 = vmatprep.subr.bf16.mxu0 %v1973_v0  ;;  %1747 = vmatprep.subr.bf16.mxu1 %v1973_v0  ;;  %v73_v10 = vld [vmem:[%s2503_s0] sm:$0x1]  ;;  %v1643_v11 = vld [vmem:[%s2504_s1 + $0x7] sm:$0x1]  ;;  %v1649_v56 = vld [vmem:[%s2503_s0 + $0x1] sm:$0x1] }
   0x5   :  { %v74_v12 = vunpack.c.l.bf16 %v73_v10  ;;  %v188_v13 = vunpack.c.l.bf16 %v1643_v11  ;;  %v301_v57 = vunpack.c.l.bf16 %v1649_v56  ;;  %v1652_v58 = vld [vmem:[%s2504_s1 + $0x6] sm:$0x1] }
   0x6   :  { %v393_v61 = vunpack.c.l.bf16 %v1652_v58 }
   0x7   :  { %1740 = vmatpush3.bf16.msra.mxu0 %v2033_v4  ;;  %1748 = vmatpush3.bf16.msra.mxu1 %v2044_v5 }
   0x8   :  { %v69_v6 = vld [vmem:[#allocation2] sm:$0x1]  ;;  %v71_v7 = vld [vmem:[#allocation4] sm:$0x1]  ;;  %1753 = vmatprep.subr.bf16.mxu0 %v1973_v0  ;;  %1761 = vmatprep.subr.bf16.mxu1 %v1973_v0 }
   0x9   :  { %v1642_v8 = vld.sshfl [vmem:[#allocation3] sm:$0x3 pattern:$0x76325410] }
   0xa   :  { %1742 = vmatmul.mubr.msk.bf16.vlgmr.msra.gmra.mxu0 %vm87_vm3, %v69_v6  ;;  %1750 = vmatmul.mubr.msk.bf16.vlgmr.msra.gmra.mxu1 %vm87_vm3, %v71_v7  ;;  %v1647_v9 = vld.sshfl [vmem:[#allocation5] sm:$0x3 pattern:$0x76325410] }
   0xb   :  { %145 = vrot.lane.b32.xlu1 %v1642_v8, %s1976_s2  ;;  %1754 = vmatpush3.bf16.msra.mxu0 %v2016_v1 }
   0xc   :  { %1762 = vmatpush3.bf16.msra.mxu1 %v2023_v3  ;;  %1755 = vmatprep.subr.bf16.mxu0 %v1973_v0 }
   0xd   :  { %1757 = vmatprep.mubr.msk.bf16.mxu0 %vm1975_vm1, %v1973_v0  ;;  %1763 = vmatprep.subr.bf16.mxu1 %v1973_v0 }
   0xe   :  { %1765 = vmatprep.mubr.msk.bf16.mxu1 %vm1975_vm1, %v1973_v0 }
   0xf   :  { %258 = vrot.lane.b32.xlu1 %v1647_v9, %s1976_s2  ;;  %1756 = vmatpush3.bf16.msra.mxu0 %v2033_v4 }
  0x10   :  { %1764 = vmatpush3.bf16.msra.mxu1 %v2044_v5  ;;  %1769 = vmatprep.subr.bf16.mxu0 %v1973_v0 }
  0x11   :  { %1777 = vmatprep.subr.bf16.mxu1 %v1973_v0 }
  0x7d   :  { %v146_v38 = vpop.permute.xlu1 %145 }
  0x81   :  { %v259_v40 = vpop.permute.xlu1 %258 }
  0xca   :  { %v125_v14 = vpop.f32.mrf.mxu0  ;;  %v238_v16 = vpop.f32.mrf.mxu1 }
  0xcb   :  { %v131_v15 = vadd.f32 %v125_v14, %v74_v12  ;;  %v244_v17 = vadd.f32 %v238_v16, %v188_v13 }
  0xcc   :  { %v1743_v18 = vpop.f32.mrf.mxu0  ;;  %v1751_v19 = vpop.f32.mrf.mxu1 }
  0xcd   :  { %1877 = vtanh.f32 %v131_v15  ;;  %v132_v26 = vmul.f32 0.5, %v131_v15  ;;  %v245_v27 = vmul.f32 0.5, %v244_v17 }
  0xce   :  { %v128_v20 = vpop.f32.mrf.mxu0  ;;  %1879 = vtanh.f32 %v244_v17  ;;  %v241_v21 = vpop.f32.mrf.mxu1 }
  0xcf   :  { %1881 = vtanh.f32 %v132_v26 }
  0xd0   :  { %v1744_v22 = vpop.f32.mrf.mxu0  ;;  %v1752_v23 = vpop.f32.mrf.mxu1  ;;  %1883 = vtanh.f32 %v245_v27 }
  0xda   :  { %v1878_v24 = vpop.eup %1877 }
  0xdb   :  { %150 = vrot.lane.b32.xlu0 %v1878_v24, %s1976_s2  ;;  %v1880_v25 = vpop.eup %1879 }
  0xdc   :  { %v1882_v28 = vpop.eup %1881 }
  0xdd   :  { %v134_v29 = vmul.f32 0.5, %v1882_v28  ;;  %v1884_v30 = vpop.eup %1883 }
  0xde   :  { %v247_v32 = vmul.f32 0.5, %v1884_v30 }
  0xdf   :  { %263 = vrot.lane.b32.xlu0 %v1880_v25, %s1976_s2  ;;  %v135_v31 = vadd.f32 0.5, %v134_v29 }
  0xe0   :  { %v248_v35 = vadd.f32 0.5, %v247_v32 }
  0xe1   :  { %v148_v39 = vmul.f32 %v146_v38, %v135_v31 }
  0xe2   :  { %v261_v43 = vmul.f32 %v259_v40, %v248_v35 }
 0x14d   :  { %v151_v33 = vpop.permute.xlu0 %150 }
 0x14e   :  { %v153_v34 = vmul.f32 %v151_v33, %v135_v31 }
 0x150   :  { %155 = vrot.lane.b32.xlu0 %v153_v34, %s1976_s2 }
 0x151   :  { %v264_v36 = vpop.permute.xlu0 %263 }
 0x152   :  { %v266_v37 = vmul.f32 %v264_v36, %v248_v35 }
 0x154   :  { %268 = vrot.lane.b32.xlu1 %v266_v37, %s1976_s2 }
 0x1c2   :  { %v156_v41 = vpop.permute.xlu0 %155 }
 0x1c3   :  { %v2077_v42 = vadd.f32 %v156_v41, %v148_v39  ;;  %v1655_v41 = vld [vmem:[%s2503_s0 + $0x2] sm:$0x1] }
 0x1c5   :  { %1885 = vtanh.f32 %v2077_v42 }
 0x1c6   :  { %v269_v44 = vpop.permute.xlu1 %268 }
 0x1c7   :  { %v2080_v45 = vadd.f32 %v269_v44, %v261_v43  ;;  %v1658_v43 = vld [vmem:[%s2504_s1 + $0x5] sm:$0x1] }
 0x1c9   :  { %1887 = vtanh.f32 %v2080_v45 }
 0x1d2   :  { %v1886_v46 = vpop.eup %1885 }
 0x1d3   :  { %161 = vrot.lane.b32.xlu0 %v1886_v46, %s1976_s2  ;;  %v577_v46 = vunpack.c.l.bf16 %v1658_v43 }
 0x1d6   :  { %v1888_v47 = vpop.eup %1887 }
 0x1d7   :  { %274 = vrot.lane.b32.xlu1 %v1888_v47, %s1976_s2 }
 0x245   :  { %v162_v48 = vpop.permute.xlu0 %161 }
 0x246   :  { %v164_v49 = vmul.f32 %v162_v48, %v135_v31 }
 0x248   :  { %v2085_v50 = vpack.c.bf16 %v164_v49, %v164_v49 }
 0x249   :  { %v275_v51 = vpop.permute.xlu1 %274 }
 0x24a   :  { %v277_v52 = vmul.f32 %v275_v51, %v248_v35  ;;  %302 = vrot.lane.b32.xlu0 %v2085_v50, %s1977_s29 }
 0x24c   :  { %v2089_v53 = vpack.c.bf16 %v277_v52, %v277_v52 }
 0x24e   :  { %394 = vrot.lane.b32.xlu1 %v2089_v53, %s1977_s29 }
 0x2bc   :  { %v303_v54 = vpop.permute.xlu0 %302 }
 0x2bd   :  { %1758 = vmatmul.mubr.msk.bf16.vlgmr.msra.gmra.mxu0 %vm87_vm3, %v303_v54 }
 0x2be   :  { %1770 = vmatpush3.bf16.msra.mxu0 %v2016_v1  ;;  %1773 = vmatprep.mubr.msk.bf16.mxu0 %vm1975_vm1, %v1973_v0 }
 0x2bf   :  { %1771 = vmatprep.subr.bf16.mxu0 %v1973_v0 }
 0x2c0   :  { %v395_v55 = vpop.permute.xlu1 %394 }
 0x2c1   :  { %1766 = vmatmul.mubr.msk.bf16.vlgmr.msra.gmra.mxu1 %vm87_vm3, %v395_v55 }
 0x2c2   :  { %1778 = vmatpush3.bf16.msra.mxu1 %v2023_v3  ;;  %1772 = vmatpush3.bf16.msra.mxu0 %v2033_v4 }
 0x2c3   :  { %1779 = vmatprep.subr.bf16.mxu1 %v1973_v0  ;;  %1781 = vmatprep.mubr.msk.bf16.mxu1 %vm1975_vm1, %v1973_v0 }
 0x2c4   :  { %1785 = vmatprep.subr.bf16.mxu0 %v1973_v0 }
 0x2c6   :  { %1780 = vmatpush3.bf16.msra.mxu1 %v2044_v5 }
 0x2c7   :  { %1793 = vmatprep.subr.bf16.mxu1 %v1973_v0 }
 0x37d   :  { %v341_v59 = vpop.f32.mrf.mxu0 }
 0x37e   :  { %v347_v60 = vadd.f32 %v341_v59, %v301_v57 }
 0x37f   :  { %v1759_v62 = vpop.f32.mrf.mxu0 }
 0x380   :  { %1889 = vtanh.f32 %v347_v60  ;;  %v348_v13 = vmul.f32 0.5, %v347_v60 }
 0x381   :  { %v344_v63 = vpop.f32.mrf.mxu0  ;;  %v433_v2 = vpop.f32.mrf.mxu1 }
 0x382   :  { %v439_v6 = vadd.f32 %v433_v2, %v393_v61 }
 0x383   :  { %v1760_v7 = vpop.f32.mrf.mxu0  ;;  %v1767_v8 = vpop.f32.mrf.mxu1 }
 0x384   :  { %1891 = vtanh.f32 %v439_v6  ;;  %v440_v14 = vmul.f32 0.5, %v439_v6 }
 0x385   :  { %v436_v9 = vpop.f32.mrf.mxu1  ;;  %1893 = vtanh.f32 %v348_v13 }
 0x386   :  { %1895 = vtanh.f32 %v440_v14 }
 0x387   :  { %v1768_v10 = vpop.f32.mrf.mxu1 }
 0x38d   :  { %v1890_v11 = vpop.eup %1889 }
 0x38e   :  { %355 = vrot.lane.b32.xlu0 %v1890_v11, %s1976_s2 }
 0x391   :  { %v1892_v12 = vpop.eup %1891 }
 0x392   :  { %447 = vrot.lane.b32.xlu1 %v1892_v12, %s1976_s2  ;;  %v1894_v15 = vpop.eup %1893 }
 0x393   :  { %v350_v16 = vmul.f32 0.5, %v1894_v15  ;;  %v1896_v17 = vpop.eup %1895 }
 0x394   :  { %v442_v19 = vmul.f32 0.5, %v1896_v17 }
 0x395   :  { %v351_v18 = vadd.f32 0.5, %v350_v16 }
 0x396   :  { %v443_v22 = vadd.f32 0.5, %v442_v19 }
 0x397   :  { %v353_v25 = vmul.f32 %v351_v18, %v2077_v42  ;;  %v485_v42 = vunpack.c.l.bf16 %v1655_v41 }
 0x398   :  { %v445_v28 = vmul.f32 %v443_v22, %v2080_v45 }
 0x400   :  { %v356_v20 = vpop.permute.xlu0 %355 }
 0x401   :  { %v358_v21 = vmul.f32 %v356_v20, %v351_v18 }
 0x403   :  { %360 = vrot.lane.b32.xlu0 %v358_v21, %s1976_s2 }
 0x404   :  { %v448_v23 = vpop.permute.xlu1 %447 }
 0x405   :  { %v450_v24 = vmul.f32 %v448_v23, %v443_v22 }
 0x407   :  { %452 = vrot.lane.b32.xlu1 %v450_v24, %s1976_s2 }
 0x475   :  { %v361_v26 = vpop.permute.xlu0 %360 }
 0x476   :  { %v2118_v27 = vadd.f32 %v361_v26, %v353_v25 }
 0x478   :  { %1897 = vtanh.f32 %v2118_v27 }
 0x479   :  { %v453_v29 = vpop.permute.xlu1 %452 }
 0x47a   :  { %v2122_v30 = vadd.f32 %v453_v29, %v445_v28  ;;  %v1661_v28 = vld [vmem:[%s2503_s0 + $0x3] sm:$0x1] }
 0x47b   :  { %v669_v29 = vunpack.c.l.bf16 %v1661_v28 }
 0x47c   :  { %1899 = vtanh.f32 %v2122_v30 }
 0x485   :  { %v1898_v31 = vpop.eup %1897 }
 0x486   :  { %366 = vrot.lane.b32.xlu0 %v1898_v31, %s1976_s2 }
 0x489   :  { %v1900_v32 = vpop.eup %1899 }
 0x48a   :  { %458 = vrot.lane.b32.xlu1 %v1900_v32, %s1976_s2 }
 0x4f8   :  { %v367_v33 = vpop.permute.xlu0 %366 }
 0x4f9   :  { %v369_v34 = vmul.f32 %v367_v33, %v351_v18 }
 0x4fb   :  { %v2127_v35 = vpack.c.bf16 %v369_v34, %v369_v34 }
 0x4fc   :  { %v459_v36 = vpop.permute.xlu1 %458 }
 0x4fd   :  { %v461_v37 = vmul.f32 %v459_v36, %v443_v22  ;;  %486 = vrot.lane.b32.xlu0 %v2127_v35, %s1977_s29 }
 0x4ff   :  { %v2131_v38 = vpack.c.bf16 %v461_v37, %v461_v37 }
 0x501   :  { %578 = vrot.lane.b32.xlu1 %v2131_v38, %s1977_s29 }
 0x56f   :  { %v487_v39 = vpop.permute.xlu0 %486 }
 0x570   :  { %1774 = vmatmul.mubr.msk.bf16.vlgmr.msra.gmra.mxu0 %vm87_vm3, %v487_v39 }
 0x571   :  { %1786 = vmatpush3.bf16.msra.mxu0 %v2016_v1  ;;  %1789 = vmatprep.mubr.msk.bf16.mxu0 %vm1975_vm1, %v1973_v0 }
 0x572   :  { %1787 = vmatprep.subr.bf16.mxu0 %v1973_v0 }
 0x573   :  { %v579_v40 = vpop.permute.xlu1 %578 }
 0x574   :  { %1782 = vmatmul.mubr.msk.bf16.vlgmr.msra.gmra.mxu1 %vm87_vm3, %v579_v40 }
 0x575   :  { %1794 = vmatpush3.bf16.msra.mxu1 %v2023_v3  ;;  %1788 = vmatpush3.bf16.msra.mxu0 %v2033_v4 }
 0x576   :  { %1795 = vmatprep.subr.bf16.mxu1 %v1973_v0  ;;  %1797 = vmatprep.mubr.msk.bf16.mxu1 %vm1975_vm1, %v1973_v0 }
 0x577   :  { %1801 = vmatprep.subr.bf16.mxu0 %v1973_v0 }
 0x579   :  { %1796 = vmatpush3.bf16.msra.mxu1 %v2044_v5 }
 0x57a   :  { %1809 = vmatprep.subr.bf16.mxu1 %v1973_v0 }
 0x630   :  { %v525_v44 = vpop.f32.mrf.mxu0 }
 0x631   :  { %v531_v45 = vadd.f32 %v525_v44, %v485_v42 }
 0x632   :  { %v1775_v47 = vpop.f32.mrf.mxu0 }
 0x633   :  { %1901 = vtanh.f32 %v531_v45  ;;  %v532_v59 = vmul.f32 0.5, %v531_v45 }
 0x634   :  { %v528_v48 = vpop.f32.mrf.mxu0  ;;  %v617_v49 = vpop.f32.mrf.mxu1 }
 0x635   :  { %v623_v51 = vadd.f32 %v617_v49, %v577_v46 }
 0x636   :  { %v1776_v52 = vpop.f32.mrf.mxu0  ;;  %v1783_v54 = vpop.f32.mrf.mxu1 }
 0x637   :  { %1903 = vtanh.f32 %v623_v51  ;;  %v624_v60 = vmul.f32 0.5, %v623_v51 }
 0x638   :  { %v620_v55 = vpop.f32.mrf.mxu1  ;;  %1905 = vtanh.f32 %v532_v59 }
 0x639   :  { %1907 = vtanh.f32 %v624_v60 }
 0x63a   :  { %v1784_v56 = vpop.f32.mrf.mxu1 }
 0x640   :  { %v1902_v57 = vpop.eup %1901 }
 0x641   :  { %539 = vrot.lane.b32.xlu0 %v1902_v57, %s1976_s2 }
 0x644   :  { %v1904_v58 = vpop.eup %1903 }
 0x645   :  { %631 = vrot.lane.b32.xlu1 %v1904_v58, %s1976_s2  ;;  %v1906_v61 = vpop.eup %1905 }
 0x646   :  { %v534_v62 = vmul.f32 0.5, %v1906_v61  ;;  %v1908_v63 = vpop.eup %1907 }
 0x647   :  { %v626_v6 = vmul.f32 0.5, %v1908_v63 }
 0x648   :  { %v535_v2 = vadd.f32 0.5, %v534_v62 }
 0x649   :  { %v627_v9 = vadd.f32 0.5, %v626_v6 }
 0x64a   :  { %v537_v12 = vmul.f32 %v535_v2, %v2118_v27 }
 0x64b   :  { %v629_v15 = vmul.f32 %v627_v9, %v2122_v30  ;;  %v1664_v30 = vld [vmem:[%s2504_s1 + $0x4] sm:$0x1] }
 0x64c   :  { %v761_v33 = vunpack.c.l.bf16 %v1664_v30 }
 0x6b3   :  { %v540_v7 = vpop.permute.xlu0 %539 }
 0x6b4   :  { %v542_v8 = vmul.f32 %v540_v7, %v535_v2 }
 0x6b6   :  { %544 = vrot.lane.b32.xlu0 %v542_v8, %s1976_s2 }
 0x6b7   :  { %v632_v10 = vpop.permute.xlu1 %631 }
 0x6b8   :  { %v634_v11 = vmul.f32 %v632_v10, %v627_v9 }
 0x6ba   :  { %636 = vrot.lane.b32.xlu1 %v634_v11, %s1976_s2 }
 0x728   :  { %v545_v13 = vpop.permute.xlu0 %544 }
 0x729   :  { %v2160_v14 = vadd.f32 %v545_v13, %v537_v12 }
 0x72b   :  { %1909 = vtanh.f32 %v2160_v14 }
 0x72c   :  { %v637_v16 = vpop.permute.xlu1 %636 }
 0x72d   :  { %v2164_v17 = vadd.f32 %v637_v16, %v629_v15 }
 0x72f   :  { %1911 = vtanh.f32 %v2164_v17 }
 0x738   :  { %v1910_v18 = vpop.eup %1909 }
 0x739   :  { %550 = vrot.lane.b32.xlu0 %v1910_v18, %s1976_s2 }
 0x73c   :  { %v1912_v19 = vpop.eup %1911 }
 0x73d   :  { %642 = vrot.lane.b32.xlu1 %v1912_v19, %s1976_s2  ;;  %v1670_v19 = vld [vmem:[%s2504_s1 + $0x3] sm:$0x1] }
 0x7ab   :  { %v551_v20 = vpop.permute.xlu0 %550 }
 0x7ac   :  { %v553_v21 = vmul.f32 %v551_v20, %v535_v2 }
 0x7ae   :  { %v2169_v22 = vpack.c.bf16 %v553_v21, %v553_v21 }
 0x7af   :  { %v643_v23 = vpop.permute.xlu1 %642 }
 0x7b0   :  { %v645_v24 = vmul.f32 %v643_v23, %v627_v9  ;;  %670 = vrot.lane.b32.xlu0 %v2169_v22, %s1977_s29  ;;  %v945_v23 = vunpack.c.l.bf16 %v1670_v19 }
 0x7b2   :  { %v2173_v25 = vpack.c.bf16 %v645_v24, %v645_v24 }
 0x7b4   :  { %762 = vrot.lane.b32.xlu1 %v2173_v25, %s1977_s29 }
 0x822   :  { %v671_v26 = vpop.permute.xlu0 %670 }
 0x823   :  { %1790 = vmatmul.mubr.msk.bf16.vlgmr.msra.gmra.mxu0 %vm87_vm3, %v671_v26 }
 0x824   :  { %1802 = vmatpush3.bf16.msra.mxu0 %v2016_v1  ;;  %1805 = vmatprep.mubr.msk.bf16.mxu0 %vm1975_vm1, %v1973_v0 }
 0x825   :  { %1803 = vmatprep.subr.bf16.mxu0 %v1973_v0 }
 0x826   :  { %v763_v27 = vpop.permute.xlu1 %762 }
 0x827   :  { %1798 = vmatmul.mubr.msk.bf16.vlgmr.msra.gmra.mxu1 %vm87_vm3, %v763_v27 }
 0x828   :  { %1810 = vmatpush3.bf16.msra.mxu1 %v2023_v3  ;;  %1804 = vmatpush3.bf16.msra.mxu0 %v2033_v4 }
 0x829   :  { %1811 = vmatprep.subr.bf16.mxu1 %v1973_v0  ;;  %1813 = vmatprep.mubr.msk.bf16.mxu1 %vm1975_vm1, %v1973_v0 }
 0x82a   :  { %1817 = vmatprep.subr.bf16.mxu0 %v1973_v0 }
 0x82c   :  { %1812 = vmatpush3.bf16.msra.mxu1 %v2044_v5 }
 0x82d   :  { %1825 = vmatprep.subr.bf16.mxu1 %v1973_v0 }
 0x8e3   :  { %v709_v31 = vpop.f32.mrf.mxu0 }
 0x8e4   :  { %v715_v32 = vadd.f32 %v709_v31, %v669_v29 }
 0x8e5   :  { %v1791_v34 = vpop.f32.mrf.mxu0 }
 0x8e6   :  { %1913 = vtanh.f32 %v715_v32  ;;  %v716_v46 = vmul.f32 0.5, %v715_v32 }
 0x8e7   :  { %v712_v36 = vpop.f32.mrf.mxu0  ;;  %v801_v37 = vpop.f32.mrf.mxu1 }
 0x8e8   :  { %v807_v39 = vadd.f32 %v801_v37, %v761_v33 }
 0x8e9   :  { %v1792_v40 = vpop.f32.mrf.mxu0  ;;  %v1799_v41 = vpop.f32.mrf.mxu1 }
 0x8ea   :  { %1915 = vtanh.f32 %v807_v39  ;;  %v808_v47 = vmul.f32 0.5, %v807_v39 }
 0x8eb   :  { %v804_v42 = vpop.f32.mrf.mxu1  ;;  %1917 = vtanh.f32 %v716_v46 }
 0x8ec   :  { %1919 = vtanh.f32 %v808_v47 }
 0x8ed   :  { %v1800_v43 = vpop.f32.mrf.mxu1 }
 0x8f3   :  { %v1914_v44 = vpop.eup %1913 }
 0x8f4   :  { %723 = vrot.lane.b32.xlu0 %v1914_v44, %s1976_s2 }
 0x8f7   :  { %v1916_v45 = vpop.eup %1915 }
 0x8f8   :  { %815 = vrot.lane.b32.xlu1 %v1916_v45, %s1976_s2  ;;  %v1918_v48 = vpop.eup %1917 }
 0x8f9   :  { %v718_v49 = vmul.f32 0.5, %v1918_v48  ;;  %v1920_v51 = vpop.eup %1919 }
 0x8fa   :  { %v810_v54 = vmul.f32 0.5, %v1920_v51 }
 0x8fb   :  { %v719_v52 = vadd.f32 0.5, %v718_v49 }
 0x8fc   :  { %v811_v57 = vadd.f32 0.5, %v810_v54 }
 0x8fd   :  { %v721_v60 = vmul.f32 %v719_v52, %v2160_v14 }
 0x8fe   :  { %v813_v63 = vmul.f32 %v811_v57, %v2164_v17  ;;  %v1667_v17 = vld [vmem:[%s2503_s0 + $0x4] sm:$0x1] }
 0x8ff   :  { %v853_v18 = vunpack.c.l.bf16 %v1667_v17 }
 0x966   :  { %v724_v55 = vpop.permute.xlu0 %723 }
 0x967   :  { %v726_v56 = vmul.f32 %v724_v55, %v719_v52 }
 0x969   :  { %728 = vrot.lane.b32.xlu0 %v726_v56, %s1976_s2 }
 0x96a   :  { %v816_v58 = vpop.permute.xlu1 %815 }
 0x96b   :  { %v818_v59 = vmul.f32 %v816_v58, %v811_v57 }
 0x96d   :  { %820 = vrot.lane.b32.xlu1 %v818_v59, %s1976_s2 }
 0x9db   :  { %v729_v61 = vpop.permute.xlu0 %728 }
 0x9dc   :  { %v2202_v62 = vadd.f32 %v729_v61, %v721_v60 }
 0x9de   :  { %1921 = vtanh.f32 %v2202_v62 }
 0x9df   :  { %v821_v2 = vpop.permute.xlu1 %820 }
 0x9e0   :  { %v2206_v6 = vadd.f32 %v821_v2, %v813_v63 }
 0x9e2   :  { %1923 = vtanh.f32 %v2206_v6 }
 0x9eb   :  { %v1922_v7 = vpop.eup %1921 }
 0x9ec   :  { %734 = vrot.lane.b32.xlu0 %v1922_v7, %s1976_s2 }
 0x9ef   :  { %v1924_v8 = vpop.eup %1923 }
 0x9f0   :  { %826 = vrot.lane.b32.xlu1 %v1924_v8, %s1976_s2  ;;  %v1673_v8 = vld [vmem:[%s2503_s0 + $0x5] sm:$0x1] }
 0xa5e   :  { %v735_v9 = vpop.permute.xlu0 %734 }
 0xa5f   :  { %v737_v10 = vmul.f32 %v735_v9, %v719_v52  ;;  %v1037_v9 = vunpack.c.l.bf16 %v1673_v8 }
 0xa61   :  { %v2211_v11 = vpack.c.bf16 %v737_v10, %v737_v10  ;;  %v1676_v10 = vld [vmem:[%s2504_s1 + $0x2] sm:$0x1] }
 0xa62   :  { %v827_v12 = vpop.permute.xlu1 %826 }
 0xa63   :  { %v829_v13 = vmul.f32 %v827_v12, %v811_v57  ;;  %854 = vrot.lane.b32.xlu0 %v2211_v11, %s1977_s29 }
 0xa65   :  { %v2215_v14 = vpack.c.bf16 %v829_v13, %v829_v13 }
 0xa67   :  { %946 = vrot.lane.b32.xlu1 %v2215_v14, %s1977_s29 }
 0xad5   :  { %v855_v15 = vpop.permute.xlu0 %854 }
 0xad6   :  { %1806 = vmatmul.mubr.msk.bf16.vlgmr.msra.gmra.mxu0 %vm87_vm3, %v855_v15  ;;  %v1129_v15 = vunpack.c.l.bf16 %v1676_v10 }
 0xad7   :  { %1818 = vmatpush3.bf16.msra.mxu0 %v2016_v1  ;;  %1821 = vmatprep.mubr.msk.bf16.mxu0 %vm1975_vm1, %v1973_v0 }
 0xad8   :  { %1819 = vmatprep.subr.bf16.mxu0 %v1973_v0 }
 0xad9   :  { %v947_v16 = vpop.permute.xlu1 %946 }
 0xada   :  { %1814 = vmatmul.mubr.msk.bf16.vlgmr.msra.gmra.mxu1 %vm87_vm3, %v947_v16 }
 0xadb   :  { %1826 = vmatpush3.bf16.msra.mxu1 %v2023_v3  ;;  %1820 = vmatpush3.bf16.msra.mxu0 %v2033_v4 }
 0xadc   :  { %1827 = vmatprep.subr.bf16.mxu1 %v1973_v0  ;;  %1829 = vmatprep.mubr.msk.bf16.mxu1 %vm1975_vm1, %v1973_v0 }
 0xadd   :  { %1833 = vmatprep.subr.bf16.mxu0 %v1973_v0 }
 0xadf   :  { %1828 = vmatpush3.bf16.msra.mxu1 %v2044_v5 }
 0xae0   :  { %1841 = vmatprep.subr.bf16.mxu1 %v1973_v0 }
 0xb96   :  { %v893_v20 = vpop.f32.mrf.mxu0 }
 0xb97   :  { %v899_v21 = vadd.f32 %v893_v20, %v853_v18 }
 0xb98   :  { %v1807_v24 = vpop.f32.mrf.mxu0 }
 0xb99   :  { %1925 = vtanh.f32 %v899_v21  ;;  %v900_v36 = vmul.f32 0.5, %v899_v21 }
 0xb9a   :  { %v896_v26 = vpop.f32.mrf.mxu0  ;;  %v985_v27 = vpop.f32.mrf.mxu1 }
 0xb9b   :  { %v991_v28 = vadd.f32 %v985_v27, %v945_v23 }
 0xb9c   :  { %v1808_v29 = vpop.f32.mrf.mxu0  ;;  %v1815_v30 = vpop.f32.mrf.mxu1 }
 0xb9d   :  { %1927 = vtanh.f32 %v991_v28  ;;  %v992_v37 = vmul.f32 0.5, %v991_v28 }
 0xb9e   :  { %v988_v31 = vpop.f32.mrf.mxu1  ;;  %1929 = vtanh.f32 %v900_v36 }
 0xb9f   :  { %1931 = vtanh.f32 %v992_v37 }
 0xba0   :  { %v1816_v32 = vpop.f32.mrf.mxu1 }
 0xba6   :  { %v1926_v33 = vpop.eup %1925 }
 0xba7   :  { %907 = vrot.lane.b32.xlu0 %v1926_v33, %s1976_s2 }
 0xbaa   :  { %v1928_v34 = vpop.eup %1927 }
 0xbab   :  { %999 = vrot.lane.b32.xlu1 %v1928_v34, %s1976_s2  ;;  %v1930_v39 = vpop.eup %1929 }
 0xbac   :  { %v902_v40 = vmul.f32 0.5, %v1930_v39  ;;  %v1932_v41 = vpop.eup %1931 }
 0xbad   :  { %v994_v43 = vmul.f32 0.5, %v1932_v41 }
 0xbae   :  { %v903_v42 = vadd.f32 0.5, %v902_v40 }
 0xbaf   :  { %v995_v46 = vadd.f32 0.5, %v994_v43 }
 0xbb0   :  { %v905_v49 = vmul.f32 %v903_v42, %v2202_v62 }
 0xbb1   :  { %v997_v54 = vmul.f32 %v995_v46, %v2206_v6 }
 0xc19   :  { %v908_v44 = vpop.permute.xlu0 %907 }
 0xc1a   :  { %v910_v45 = vmul.f32 %v908_v44, %v903_v42 }
 0xc1c   :  { %912 = vrot.lane.b32.xlu0 %v910_v45, %s1976_s2 }
 0xc1d   :  { %v1000_v47 = vpop.permute.xlu1 %999 }
 0xc1e   :  { %v1002_v48 = vmul.f32 %v1000_v47, %v995_v46 }
 0xc20   :  { %1004 = vrot.lane.b32.xlu1 %v1002_v48, %s1976_s2 }
 0xc8e   :  { %v913_v51 = vpop.permute.xlu0 %912 }
 0xc8f   :  { %v2244_v52 = vadd.f32 %v913_v51, %v905_v49 }
 0xc91   :  { %1933 = vtanh.f32 %v2244_v52 }
 0xc92   :  { %v1005_v55 = vpop.permute.xlu1 %1004 }
 0xc93   :  { %v2248_v56 = vadd.f32 %v1005_v55, %v997_v54 }
 0xc95   :  { %1935 = vtanh.f32 %v2248_v56 }
 0xc9e   :  { %v1934_v57 = vpop.eup %1933 }
 0xc9f   :  { %918 = vrot.lane.b32.xlu0 %v1934_v57, %s1976_s2 }
 0xca2   :  { %v1936_v58 = vpop.eup %1935 }
 0xca3   :  { %1010 = vrot.lane.b32.xlu1 %v1936_v58, %s1976_s2 }
 0xd11   :  { %v919_v59 = vpop.permute.xlu0 %918 }
 0xd12   :  { %v921_v60 = vmul.f32 %v919_v59, %v903_v42 }
 0xd14   :  { %v2253_v61 = vpack.c.bf16 %v921_v60, %v921_v60 }
 0xd15   :  { %v1011_v62 = vpop.permute.xlu1 %1010 }
 0xd16   :  { %v1013_v63 = vmul.f32 %v1011_v62, %v995_v46  ;;  %1038 = vrot.lane.b32.xlu0 %v2253_v61, %s1977_s29  ;;  %v1682_v62 = vld [vmem:[%s2504_s1 + $0x1] sm:$0x1] }
 0xd18   :  { %v2257_v2 = vpack.c.bf16 %v1013_v63, %v1013_v63 }
 0xd1a   :  { %1130 = vrot.lane.b32.xlu1 %v2257_v2, %s1977_s29 }
 0xd88   :  { %v1039_v6 = vpop.permute.xlu0 %1038 }
 0xd89   :  { %1822 = vmatmul.mubr.msk.bf16.vlgmr.msra.gmra.mxu0 %vm87_vm3, %v1039_v6  ;;  %v1313_v6 = vunpack.c.l.bf16 %v1682_v62 }
 0xd8a   :  { %1834 = vmatpush3.bf16.msra.mxu0 %v2016_v1  ;;  %1837 = vmatprep.mubr.msk.bf16.mxu0 %vm1975_vm1, %v1973_v0 }
 0xd8b   :  { %1835 = vmatprep.subr.bf16.mxu0 %v1973_v0 }
 0xd8c   :  { %v1131_v7 = vpop.permute.xlu1 %1130 }
 0xd8d   :  { %1830 = vmatmul.mubr.msk.bf16.vlgmr.msra.gmra.mxu1 %vm87_vm3, %v1131_v7 }
 0xd8e   :  { %1842 = vmatpush3.bf16.msra.mxu1 %v2023_v3  ;;  %1836 = vmatpush3.bf16.msra.mxu0 %v2033_v4 }
 0xd8f   :  { %1843 = vmatprep.subr.bf16.mxu1 %v1973_v0  ;;  %1845 = vmatprep.mubr.msk.bf16.mxu1 %vm1975_vm1, %v1973_v0 }
 0xd90   :  { %1849 = vmatprep.subr.bf16.mxu0 %v1973_v0 }
 0xd92   :  { %1844 = vmatpush3.bf16.msra.mxu1 %v2044_v5 }
 0xd93   :  { %1857 = vmatprep.subr.bf16.mxu1 %v1973_v0 }
 0xe49   :  { %v1077_v12 = vpop.f32.mrf.mxu0 }
 0xe4a   :  { %v1083_v13 = vadd.f32 %v1077_v12, %v1037_v9 }
 0xe4b   :  { %v1823_v16 = vpop.f32.mrf.mxu0 }
 0xe4c   :  { %1937 = vtanh.f32 %v1083_v13  ;;  %v1084_v28 = vmul.f32 0.5, %v1083_v13 }
 0xe4d   :  { %v1080_v17 = vpop.f32.mrf.mxu0  ;;  %v1169_v18 = vpop.f32.mrf.mxu1 }
 0xe4e   :  { %v1175_v19 = vadd.f32 %v1169_v18, %v1129_v15 }
 0xe4f   :  { %v1824_v20 = vpop.f32.mrf.mxu0  ;;  %v1831_v21 = vpop.f32.mrf.mxu1 }
 0xe50   :  { %1939 = vtanh.f32 %v1175_v19  ;;  %v1176_v29 = vmul.f32 0.5, %v1175_v19 }
 0xe51   :  { %v1172_v23 = vpop.f32.mrf.mxu1  ;;  %1941 = vtanh.f32 %v1084_v28 }
 0xe52   :  { %1943 = vtanh.f32 %v1176_v29 }
 0xe53   :  { %v1832_v24 = vpop.f32.mrf.mxu1 }
 0xe59   :  { %v1938_v26 = vpop.eup %1937 }
 0xe5a   :  { %1091 = vrot.lane.b32.xlu0 %v1938_v26, %s1976_s2 }
 0xe5d   :  { %v1940_v27 = vpop.eup %1939 }
 0xe5e   :  { %1183 = vrot.lane.b32.xlu1 %v1940_v27, %s1976_s2  ;;  %v1942_v30 = vpop.eup %1941 }
 0xe5f   :  { %v1086_v31 = vmul.f32 0.5, %v1942_v30  ;;  %v1944_v32 = vpop.eup %1943 }
 0xe60   :  { %v1178_v34 = vmul.f32 0.5, %v1944_v32 }
 0xe61   :  { %v1087_v33 = vadd.f32 0.5, %v1086_v31 }
 0xe62   :  { %v1179_v39 = vadd.f32 0.5, %v1178_v34 }
 0xe63   :  { %v1089_v42 = vmul.f32 %v1087_v33, %v2244_v52 }
 0xe64   :  { %v1181_v45 = vmul.f32 %v1179_v39, %v2248_v56 }
 0xecc   :  { %v1092_v36 = vpop.permute.xlu0 %1091 }
 0xecd   :  { %v1094_v37 = vmul.f32 %v1092_v36, %v1087_v33 }
 0xecf   :  { %1096 = vrot.lane.b32.xlu0 %v1094_v37, %s1976_s2 }
 0xed0   :  { %v1184_v40 = vpop.permute.xlu1 %1183 }
 0xed1   :  { %v1186_v41 = vmul.f32 %v1184_v40, %v1179_v39 }
 0xed3   :  { %1188 = vrot.lane.b32.xlu1 %v1186_v41, %s1976_s2 }
 0xf41   :  { %v1097_v43 = vpop.permute.xlu0 %1096 }
 0xf42   :  { %v2286_v44 = vadd.f32 %v1097_v43, %v1089_v42 }
 0xf44   :  { %1945 = vtanh.f32 %v2286_v44 }
 0xf45   :  { %v1189_v46 = vpop.permute.xlu1 %1188 }
 0xf46   :  { %v2290_v47 = vadd.f32 %v1189_v46, %v1181_v45 }
 0xf48   :  { %1947 = vtanh.f32 %v2290_v47 }
 0xf51   :  { %v1946_v48 = vpop.eup %1945 }
 0xf52   :  { %1102 = vrot.lane.b32.xlu0 %v1946_v48, %s1976_s2  ;;  %v1685_v48 = vld [vmem:[%s2503_s0 + $0x7] sm:$0x1] }
 0xf55   :  { %v1948_v49 = vpop.eup %1947 }
 0xf56   :  { %1194 = vrot.lane.b32.xlu1 %v1948_v49, %s1976_s2  ;;  %v1405_v49 = vunpack.c.l.bf16 %v1685_v48 }
 0xfc4   :  { %v1103_v51 = vpop.permute.xlu0 %1102 }
 0xfc5   :  { %v1105_v52 = vmul.f32 %v1103_v51, %v1087_v33  ;;  %v1495_v51 = vld [vmem:[%s2504_s1] sm:$0x1] }
 0xfc7   :  { %v2295_v54 = vpack.c.bf16 %v1105_v52, %v1105_v52 }
 0xfc8   :  { %v1195_v55 = vpop.permute.xlu1 %1194 }
 0xfc9   :  { %v1197_v57 = vmul.f32 %v1195_v55, %v1179_v39  ;;  %1222 = vrot.lane.b32.xlu0 %v2295_v54, %s1977_s29 }
 0xfcb   :  { %v2299_v56 = vpack.c.bf16 %v1197_v57, %v1197_v57  ;;  %v1496_v57 = vunpack.c.l.bf16 %v1495_v51 }
 0xfcd   :  { %1314 = vrot.lane.b32.xlu1 %v2299_v56, %s1977_s29 }
0x103b   :  { %v1223_v58 = vpop.permute.xlu0 %1222 }
0x103c   :  { %1838 = vmatmul.mubr.msk.bf16.vlgmr.msra.gmra.mxu0 %vm87_vm3, %v1223_v58 }
0x103d   :  { %1850 = vmatpush3.bf16.msra.mxu0 %v2016_v1  ;;  %1853 = vmatprep.mubr.msk.bf16.mxu0 %vm1975_vm1, %v1973_v0  ;;  %v1679_v1 = vld [vmem:[%s2503_s0 + $0x6] sm:$0x1] }
0x103e   :  { %1851 = vmatprep.subr.bf16.mxu0 %v1973_v0  ;;  %v1221_v60 = vunpack.c.l.bf16 %v1679_v1 }
0x103f   :  { %v1315_v59 = vpop.permute.xlu1 %1314 }
0x1040   :  { %1846 = vmatmul.mubr.msk.bf16.vlgmr.msra.gmra.mxu1 %vm87_vm3, %v1315_v59 }
0x1041   :  { %1858 = vmatpush3.bf16.msra.mxu1 %v2023_v3  ;;  %1852 = vmatpush3.bf16.msra.mxu0 %v2033_v4 }
0x1042   :  { %1859 = vmatprep.subr.bf16.mxu1 %v1973_v0  ;;  %1861 = vmatprep.mubr.msk.bf16.mxu1 %vm1975_vm1, %v1973_v0 }
0x1045   :  { %1860 = vmatpush3.bf16.msra.mxu1 %v2044_v5 }
0x10fc   :  { %v1261_v63 = vpop.f32.mrf.mxu0 }
0x10fd   :  { %v1267_v3 = vadd.f32 %v1261_v63, %v1221_v60 }
0x10fe   :  { %v1839_v4 = vpop.f32.mrf.mxu0 }
0x10ff   :  { %1949 = vtanh.f32 %v1267_v3  ;;  %v1268_v16 = vmul.f32 0.5, %v1267_v3 }
0x1100   :  { %v1264_v7 = vpop.f32.mrf.mxu0  ;;  %v1353_v8 = vpop.f32.mrf.mxu1 }
0x1101   :  { %v1359_v9 = vadd.f32 %v1353_v8, %v1313_v6 }
0x1102   :  { %v1840_v0 = vpop.f32.mrf.mxu0  ;;  %v1847_v10 = vpop.f32.mrf.mxu1 }
0x1103   :  { %1951 = vtanh.f32 %v1359_v9  ;;  %v1360_v17 = vmul.f32 0.5, %v1359_v9 }
0x1104   :  { %v1356_v5 = vpop.f32.mrf.mxu1  ;;  %1953 = vtanh.f32 %v1268_v16 }
0x1105   :  { %1955 = vtanh.f32 %v1360_v17 }
0x1106   :  { %v1848_v12 = vpop.f32.mrf.mxu1 }
0x110c   :  { %v1950_v13 = vpop.eup %1949 }
0x110d   :  { %1275 = vrot.lane.b32.xlu0 %v1950_v13, %s1976_s2 }
0x1110   :  { %v1952_v15 = vpop.eup %1951 }
0x1111   :  { %1367 = vrot.lane.b32.xlu1 %v1952_v15, %s1976_s2  ;;  %v1954_v18 = vpop.eup %1953 }
0x1112   :  { %v1270_v19 = vmul.f32 0.5, %v1954_v18  ;;  %v1956_v20 = vpop.eup %1955 }
0x1113   :  { %v1362_v23 = vmul.f32 0.5, %v1956_v20 }
0x1114   :  { %v1271_v21 = vadd.f32 0.5, %v1270_v19 }
0x1115   :  { %v1363_v27 = vadd.f32 0.5, %v1362_v23 }
0x1116   :  { %v1273_v30 = vmul.f32 %v1271_v21, %v2286_v44 }
0x1117   :  { %v1365_v33 = vmul.f32 %v1363_v27, %v2290_v47 }
0x117f   :  { %v1276_v24 = vpop.permute.xlu0 %1275 }
0x1180   :  { %v1278_v26 = vmul.f32 %v1276_v24, %v1271_v21  ;;  %v1978_v24 = vmov 1966171168  }
0x1182   :  { %1280 = vrot.lane.b32.xlu0 %v1278_v26, %s1976_s2  ;;  %v168_v26 = vunpack.c.l.s4 %v1978_v24 }
0x1183   :  { %v1368_v28 = vpop.permute.xlu1 %1367 }
0x1184   :  { %v1370_v29 = vmul.f32 %v1368_v28, %v1363_v27 }
0x1186   :  { %1372 = vrot.lane.b32.xlu1 %v1370_v29, %s1976_s2 }
0x11f4   :  { %v1281_v31 = vpop.permute.xlu0 %1280 }
0x11f5   :  { %v1283_v32 = vadd.f32 %v1281_v31, %v1273_v30  ;;  %v169_v31 = vunpack.c.0.s8 %v168_v26 }
0x11f7   :  { %1957 = vtanh.f32 %v1283_v32 }
0x11f8   :  { %v1373_v34 = vpop.permute.xlu1 %1372 }
0x11f9   :  { %v1375_v36 = vadd.f32 %v1373_v34, %v1365_v33 }
0x11fb   :  { %1959 = vtanh.f32 %v1375_v36 }
0x1204   :  { %v1958_v37 = vpop.eup %1957 }
0x1205   :  { %1286 = vrot.lane.b32.xlu0 %v1958_v37, %s1976_s2 }
0x1208   :  { %v1960_v39 = vpop.eup %1959 }
0x1209   :  { %1378 = vrot.lane.b32.xlu1 %v1960_v39, %s1976_s2 }
0x1277   :  { %v1287_v40 = vpop.permute.xlu0 %1286 }
0x1278   :  { %v1289_v41 = vmul.f32 %v1287_v40, %v1271_v21 }
0x127a   :  { %v2329_v42 = vpack.c.bf16 %v1289_v41, %v1289_v41 }
0x127b   :  { %v1379_v43 = vpop.permute.xlu1 %1378 }
0x127c   :  { %v1381_v44 = vmul.f32 %v1379_v43, %v1363_v27  ;;  %1406 = vrot.lane.b32.xlu0 %v2329_v42, %s1977_s29  ;;  %v170_v27 = vlaneseq }
0x127e   :  { %v2333_v45 = vpack.c.bf16 %v1381_v44, %v1381_v44  ;;  %v171_v33 = vshrl.u32 %v170_v27, 7 }
0x1280   :  { %1497 = vrot.lane.b32.xlu1 %v2333_v45, %s1977_s29  ;;  %v2363_v34 = vsub.s32 %v169_v31, %v171_v33 }
0x1282   :  { %v286_v39 = vrot.slane %v2089_v53, %v2363_v34  ;;  %v470_v43 = vrot.slane %v2131_v38, %v2363_v34  ;;  %v930_v48 = vrot.slane %v2253_v61, %v2363_v34  ;;  %v1114_v51 = vrot.slane %v2295_v54, %v2363_v34 }
0x1283   :  { %v1206_v61 = vrot.slane %v2299_v56, %v2363_v34  ;;  %v1390_v54 = vrot.slane %v2333_v45, %v2363_v34 }
0x1284   :  { %v293_v44 = vrot.slane %v286_v39, %v2363_v34 }
0x1285   :  { %v1397_v56 = vrot.slane %v1390_v54, %v2363_v34 }
0x12ee   :  { %v1407_v46 = vpop.permute.xlu0 %1406 }
0x12ef   :  { %1854 = vmatmul.mubr.msk.bf16.vlgmr.msra.gmra.mxu0 %vm87_vm3, %v1407_v46  ;;  %v746_v46 = vrot.slane %v2211_v11, %v2363_v34  ;;  %v1022_v11 = vrot.slane %v2257_v2, %v2363_v34  ;;  %v1121_v2 = vrot.slane %v1114_v51, %v2363_v34 }
0x12f2   :  { %v1498_v47 = vpop.permute.xlu1 %1497 }
0x12f3   :  { %1862 = vmatmul.mubr.msk.bf16.vlgmr.msra.gmra.mxu1 %vm87_vm3, %v1498_v47  ;;  %v477_v47 = vrot.slane %v470_v43, %v2363_v34 }
0x13af   :  { %v1445_v52 = vpop.f32.mrf.mxu0 }
0x13b0   :  { %v1451_v55 = vadd.f32 %v1445_v52, %v1405_v49 }
0x13b1   :  { %v1855_v58 = vpop.f32.mrf.mxu0 }
0x13b2   :  { %1961 = vtanh.f32 %v1451_v55  ;;  %v1452_v8 = vmul.f32 0.5, %v1451_v55  ;;  %v1298_v55 = vrot.slane %v2329_v42, %v2363_v34  ;;  %v1213_v58 = vrot.slane %v1206_v61, %v2363_v34 }
0x13b3   :  { %v1448_v59 = vpop.f32.mrf.mxu0  ;;  %v1536_v1 = vpop.f32.mrf.mxu1  ;;  %v1979_v42 = vmov 1983009808  }
0x13b4   :  { %v1542_v60 = vadd.f32 %v1536_v1, %v1496_v57  ;;  %v1029_v57 = vrot.slane %v1022_v11, %v2363_v34  ;;  %v1305_v59 = vrot.slane %v1298_v55, %v2363_v34  ;;  %v1588_v1 = vunpack.c.l.s4 %v1979_v42 }
0x13b5   :  { %v1856_v62 = vpop.f32.mrf.mxu0  ;;  %v1863_v63 = vpop.f32.mrf.mxu1 }
0x13b6   :  { %1963 = vtanh.f32 %v1542_v60  ;;  %v1543_v9 = vmul.f32 0.5, %v1542_v60  ;;  %v1589_v63 = vunpack.c.0.s8 %v1588_v1 }
0x13b7   :  { %v1539_v3 = vpop.f32.mrf.mxu1  ;;  %1965 = vtanh.f32 %v1452_v8 }
0x13b8   :  { %1967 = vtanh.f32 %v1543_v9  ;;  %v1592_v8 = vsub.s32 %v1589_v63, %v171_v33 }
0x13b9   :  { %v1864_v6 = vpop.f32.mrf.mxu1 }
0x13bf   :  { %v1962_v4 = vpop.eup %1961 }
0x13c0   :  { %1459 = vrot.lane.b32.xlu0 %v1962_v4, %s1976_s2 }
0x13c3   :  { %v1964_v7 = vpop.eup %1963 }
0x13c4   :  { %1550 = vrot.lane.b32.xlu1 %v1964_v7, %s1976_s2  ;;  %v1966_v0 = vpop.eup %1965 }
0x13c5   :  { %v1454_v10 = vmul.f32 0.5, %v1966_v0  ;;  %v1968_v5 = vpop.eup %1967 }
0x13c6   :  { %v1545_v13 = vmul.f32 0.5, %v1968_v5 }
0x13c7   :  { %v2347_v12 = vadd.f32 0.5, %v1454_v10 }
0x13c8   :  { %v2351_v17 = vadd.f32 0.5, %v1545_v13 }
0x13c9   :  { %v1457_v20 = vmul.f32 %v2347_v12, %v1283_v32  ;;  %v173_v32 = vrot.slane %v2085_v50, %v2363_v34  ;;  %v562_v50 = vrot.slane %v2169_v22, %v2363_v34  ;;  %v838_v22 = vrot.slane %v2215_v14, %v2363_v34 }
0x13ca   :  { %v1548_v28 = vmul.f32 %v2351_v17, %v1375_v36  ;;  %v378_v36 = vrot.slane %v2127_v35, %v2363_v34  ;;  %v654_v35 = vrot.slane %v2173_v25, %v2363_v34  ;;  %v753_v25 = vrot.slane %v746_v46, %v2363_v34 }
0x13cb   :  { %v180_v40 = vrot.slane %v173_v32, %v2363_v34  ;;  %v569_v38 = vrot.slane %v562_v50, %v2363_v34  ;;  %v845_v52 = vrot.slane %v838_v22, %v2363_v34  ;;  %v937_v14 = vrot.slane %v930_v48, %v2363_v34 }
0x13cc   :  { %v385_v53 = vrot.slane %v378_v36, %v2363_v34  ;;  %v661_v49 = vrot.slane %v654_v35, %v2363_v34 }
0x1432   :  { %v1460_v15 = vpop.permute.xlu0 %1459 }
0x1433   :  { %v1462_v16 = vmul.f32 %v1460_v15, %v2347_v12 }
0x1435   :  { %1464 = vrot.lane.b32.xlu0 %v1462_v16, %s1976_s2 }
0x1436   :  { %v1551_v18 = vpop.permute.xlu1 %1550 }
0x1437   :  { %v1553_v19 = vmul.f32 %v1551_v18, %v2351_v17 }
0x1439   :  { %1555 = vrot.lane.b32.xlu1 %v1553_v19, %s1976_s2 }
0x14a7   :  { %v1465_v21 = vpop.permute.xlu0 %1464 }
0x14a8   :  { %v2356_v23 = vadd.f32 %v1465_v21, %v1457_v20 }
0x14aa   :  { %1969 = vtanh.f32 %v2356_v23  ;;  %v1593_v13 = vrot.slane %v2356_v23, %v1592_v8 }
0x14ab   :  { %v1556_v29 = vpop.permute.xlu1 %1555 }
0x14ac   :  { %v2360_v30 = vadd.f32 %v1556_v29, %v1548_v28 }
0x14ae   :  { %1971 = vtanh.f32 %v2360_v30  ;;  %v1607_v18 = vrot.slane %v2360_v30, %v1592_v8 }
0x14b7   :  { %v1970_v37 = vpop.eup %1969 }
0x14b8   :  { %1470 = vrot.lane.b32.xlu0 %v1970_v37, %s1976_s2 }
0x14bb   :  { %v1972_v41 = vpop.eup %1971 }
0x14bc   :  { %1561 = vrot.lane.b32.xlu1 %v1972_v41, %s1976_s2  ;;  %181 = vrot.lane.b32.xlu0 %v180_v40, %s1977_s29 }
0x14c0   :  { %294 = vrot.lane.b32.xlu1 %v293_v44, %s1977_s29  ;;  %386 = vrot.lane.b32.xlu0 %v385_v53, %s1977_s29 }
0x14c4   :  { %478 = vrot.lane.b32.xlu1 %v477_v47, %s1977_s29  ;;  %570 = vrot.lane.b32.xlu0 %v569_v38, %s1977_s29 }
0x14c8   :  { %662 = vrot.lane.b32.xlu1 %v661_v49, %s1977_s29  ;;  %754 = vrot.lane.b32.xlu0 %v753_v25, %s1977_s29 }
0x14cc   :  { %846 = vrot.lane.b32.xlu1 %v845_v52, %s1977_s29  ;;  %938 = vrot.lane.b32.xlu0 %v937_v14, %s1977_s29 }
0x14d0   :  { %1030 = vrot.lane.b32.xlu1 %v1029_v57, %s1977_s29  ;;  %1122 = vrot.lane.b32.xlu0 %v1121_v2, %s1977_s29 }
0x14d4   :  { %1214 = vrot.lane.b32.xlu1 %v1213_v58, %s1977_s29  ;;  %1306 = vrot.lane.b32.xlu0 %v1305_v59, %s1977_s29 }
0x14d8   :  { %1398 = vrot.lane.b32.xlu1 %v1397_v56, %s1977_s29 }
0x152a   :  { %v1471_v60 = vpop.permute.xlu0 %1470 }
0x152b   :  { %v1473_v62 = vmul.f32 %v1471_v60, %v2347_v12 }
0x152d   :  { %v1474_v3 = vpack.c.bf16 %v1473_v62, %v1473_v62 }
0x152e   :  { %v1562_v45 = vpop.permute.xlu1 %1561  ;;  %v182_v6 = vpop.permute.xlu0 %181 }
0x152f   :  { %v1482_v4 = vrot.slane %v1474_v3, %v2363_v34  ;;  %v1564_v7 = vmul.f32 %v1562_v45, %v2351_v17  ;;  %185 = vst.msk [vmem:[%s2505_s4] sm:$0x1] %vm55_vm0, %v182_v6 }
0x1531   :  { %v1565_v9 = vpack.c.bf16 %v1564_v7, %v1564_v7  ;;  %v1489_v0 = vrot.slane %v1482_v4, %v2363_v34 }
0x1532   :  { %v295_v10 = vpop.permute.xlu1 %294  ;;  %v387_v5 = vpop.permute.xlu0 %386 }
0x1533   :  { %v1573_v12 = vrot.slane %v1565_v9, %v2363_v34  ;;  %1648 = vst.msk [vmem:[%s2506_s5 + $0x7] sm:$0x1] %vm55_vm0, %v295_v10  ;;  %1651 = vst.msk [vmem:[%s2505_s4 + $0x1] sm:$0x1] %vm55_vm0, %v387_v5  ;;  %1490 = vrot.lane.b32.xlu0 %v1489_v0, %s1977_s29 }
0x1535   :  { %v1580_v15 = vrot.slane %v1573_v12, %v2363_v34 }
0x1536   :  { %v479_v16 = vpop.permute.xlu1 %478  ;;  %v571_v17 = vpop.permute.xlu0 %570 }
0x1537   :  { %1654 = vst.msk [vmem:[%s2506_s5 + $0x6] sm:$0x1] %vm55_vm0, %v479_v16  ;;  %1657 = vst.msk [vmem:[%s2505_s4 + $0x2] sm:$0x1] %vm55_vm0, %v571_v17  ;;  %1581 = vrot.lane.b32.xlu1 %v1580_v15, %s1977_s29  ;;  %1594 = vrot.lane.b32.xlu0 %v1593_v13, %s1980_s15 }
0x153a   :  { %v663_v19 = vpop.permute.xlu1 %662  ;;  %v755_v20 = vpop.permute.xlu0 %754 }
0x153b   :  { %1660 = vst.msk [vmem:[%s2506_s5 + $0x5] sm:$0x1] %vm55_vm0, %v663_v19  ;;  %1663 = vst.msk [vmem:[%s2505_s4 + $0x3] sm:$0x1] %vm55_vm0, %v755_v20  ;;  %1608 = vrot.lane.b32.xlu1 %v1607_v18, %s1980_s15 }
0x153e   :  { %v847_v21 = vpop.permute.xlu1 %846  ;;  %v939_v23 = vpop.permute.xlu0 %938 }
0x153f   :  { %1666 = vst.msk [vmem:[%s2506_s5 + $0x4] sm:$0x1] %vm55_vm0, %v847_v21  ;;  %1669 = vst.msk [vmem:[%s2505_s4 + $0x4] sm:$0x1] %vm55_vm0, %v939_v23 }
0x1542   :  { %v1031_v24 = vpop.permute.xlu1 %1030  ;;  %v1123_v26 = vpop.permute.xlu0 %1122 }
0x1543   :  { %1672 = vst.msk [vmem:[%s2506_s5 + $0x3] sm:$0x1] %vm55_vm0, %v1031_v24  ;;  %1675 = vst.msk [vmem:[%s2505_s4 + $0x5] sm:$0x1] %vm55_vm0, %v1123_v26 }
0x1546   :  { %v1215_v27 = vpop.permute.xlu1 %1214  ;;  %v1307_v28 = vpop.permute.xlu0 %1306 }
0x1547   :  { %1678 = vst.msk [vmem:[%s2506_s5 + $0x2] sm:$0x1] %vm55_vm0, %v1215_v27  ;;  %1681 = vst.msk [vmem:[%s2505_s4 + $0x6] sm:$0x1] %vm55_vm0, %v1307_v28 }
0x154a   :  { %v1399_v29 = vpop.permute.xlu1 %1398 }
0x154b   :  { %1684 = vst.msk [vmem:[%s2506_s5 + $0x1] sm:$0x1] %vm55_vm0, %v1399_v29 }
0x15a5   :  { %v1491_v30 = vpop.permute.xlu0 %1490 }
0x15a6   :  { %1687 = vst.msk [vmem:[%s2505_s4 + $0x7] sm:$0x1] %vm55_vm0, %v1491_v30  ;;  %1585 = vst.msk [vmem:[#allocation2] sm:$0x1] %vm55_vm0, %v1491_v30 }
0x15a9   :  { %v1582_v31 = vpop.permute.xlu1 %1581  ;;  %v1595_v33 = vpop.permute.xlu0 %1594 }
0x15aa   :  { %1584 = vst.msk [vmem:[%s2506_s5] sm:$0x1] %vm55_vm0, %v1582_v31  ;;  %1599 = vst.msk [vmem:[#allocation4] sm:$0x1] %vm55_vm0, %v1582_v31 }
0x15ab   :  { %1598 = vst.msk [vmem:[#allocation3] sm:$0x3] %vm57_vm2, %v1595_v33 }
0x15ad   :  { %v1609_v34 = vpop.permute.xlu1 %1608 }
0x15ae   :  { %1611 = vst.msk [vmem:[#allocation5] sm:$0x3] %vm57_vm2, %v1609_v34 }

</bundles_post_ra>
